<compile_context>
chip_gen: v6e
topology: v6e:2x2x1
jax: 0.10.0
libtpu: 0.0.40
codegen_flags: <defaults>
</compile_context>

<pallas_src>
import jax
import jax.numpy as jnp
from jax import lax
from jax.experimental import pallas as pl
from jax.experimental.pallas import tpu as pltpu


def _round_up(x: int, m: int) -> int:
    return (x + m - 1) // m * m


def _fc_kernel(x_ref, w_ref, b_ref, o_ref):
    """One (tm, OUT) output tile, full-K matmul on the MXU.

    x_ref: (tm, K)    flattened-input tile
    w_ref: (OUT, K)   full weight, native nn.Linear layout (VMEM-resident)
    b_ref: (1, OUT)   bias
    o_ref: (tm, OUT)  output tile
    """
    # y = x @ W^T : contract the last dim of both operands (no transpose is
    # materialised; the MXU consumes the trans_b form directly).
    y = lax.dot_general(
        x_ref[...],
        w_ref[...],
        dimension_numbers=(((1,), (1,)), ((), ())),
        preferred_element_type=jnp.float32,
    )
    o_ref[...] = (y + b_ref[...]).astype(o_ref.dtype)


@jax.jit
def fc_layer(x, weight, bias):
    """Forward of FCLayer: flatten x to (N, C*H*W), then Linear -> (N, 512)."""
    n = x.shape[0]
    x_flat = x.reshape(n, -1).astype(jnp.float32)          # nn.Flatten()
    f = x_flat.shape[1]
    out_f = weight.shape[0]

    # Lane/sublane-aligned padded extents.  For this module's natural shapes
    # (K = C*H*W = 1024, OUT = 512) every pad below is a no-op.
    f_p = _round_up(f, 128)
    o_p = _round_up(out_f, 128)
    tm = min(256, _round_up(n, 8))
    m_p = _round_up(n, tm)

    x_p = x_flat
    if (m_p, f_p) != (n, f):
        x_p = jnp.pad(x_p, ((0, m_p - n), (0, f_p - f)))

    w_p = weight.astype(jnp.float32)                       # native (out, in) layout
    if (o_p, f_p) != (out_f, f):
        w_p = jnp.pad(w_p, ((0, o_p - out_f), (0, f_p - f)))

    b_p = bias.astype(jnp.float32).reshape(1, out_f)
    if o_p != out_f:
        b_p = jnp.pad(b_p, ((0, 0), (0, o_p - out_f)))

    grid = (m_p // tm,)

    y = pl.pallas_call(
        _fc_kernel,
        out_shape=jax.ShapeDtypeStruct((m_p, o_p), jnp.float32),
        grid_spec=pltpu.PrefetchScalarGridSpec(
            num_scalar_prefetch=0,
            grid=grid,
            in_specs=[
                pl.BlockSpec((tm, f_p), lambda i: (i, 0)),     # x tile streams over M
                pl.BlockSpec((o_p, f_p), lambda i: (0, 0)),    # weight: constant block -> resident
                pl.BlockSpec((1, o_p), lambda i: (0, 0)),      # bias: resident
            ],
            out_specs=pl.BlockSpec((tm, o_p), lambda i: (i, 0)),
        ),
        compiler_params=pltpu.CompilerParams(
            dimension_semantics=("parallel",),
        ),
    )(x_p, w_p, b_p)

    return y[:n, :out_f]


if __name__ == "__main__":
    # Shapes implied by the module: batch=2, in_channels=4, shape_x=shape_y=16
    # => in_features = 4*16*16 = 1024, out_features = 512.
    N, C, H, W = 2, 4, 16, 16
    IN_FEATURES = C * H * W
    OUT_FEATURES = 512

    key = jax.random.PRNGKey(0)
    kx, kw, kb = jax.random.split(key, 3)
    x = jax.random.normal(kx, (N, C, H, W), jnp.float32)
    # nn.Linear parameters: weight (out, in), bias (out,)
    weight = 0.05 * jax.random.normal(kw, (OUT_FEATURES, IN_FEATURES), jnp.float32)
    bias = 0.1 * jax.random.normal(kb, (OUT_FEATURES,), jnp.float32)

    out = jax.block_until_ready(fc_layer(x, weight, bias))
    assert out.shape == (N, OUT_FEATURES) and out.dtype == jnp.float32

    # Pure-JAX reference mirroring the PyTorch forward (default matmul precision,
    # same MXU path as the kernel; tolerance sized for bf16-rounded operands).
    ref = jnp.dot(x.reshape(N, -1), weight.T) + bias
    err = float(jnp.max(jnp.abs(out - ref)))
    tol = 2e-2 * (1.0 + float(jnp.max(jnp.abs(ref))))
    if err > tol:
        raise AssertionError(f"Pallas output mismatch vs reference: max abs err = {err}")
    print("KERNEL_OK")
</pallas_src>

<mosaic_0001>
module attributes {stable_mosaic.version = 11 : i64} {
  func.func @_fc_kernel(%arg0: i32, %arg1: memref<8x1024xf32, #tpu.memory_space<vmem>>, %arg2: memref<512x1024xf32, #tpu.memory_space<vmem>>, %arg3: memref<1x512xf32, #tpu.memory_space<vmem>>, %arg4: memref<8x512xf32, #tpu.memory_space<vmem>>) attributes {dimension_semantics = [#tpu.dimension_semantics<parallel>], iteration_bounds = array<i64: 1>, scalar_prefetch = 0 : i64, scratch_operands = 0 : i64, tpu.core_type = #tpu.core_type<tc>, window_params = [{transform_indices = @transform_0, window_bounds = array<i64: 8, 1024>}, {pipeline_mode = #tpu.pipeline_mode<synchronous>, transform_indices = @transform_1, window_bounds = array<i64: 512, 1024>}, {pipeline_mode = #tpu.pipeline_mode<synchronous>, transform_indices = @transform_2, window_bounds = array<i64: 1, 512>}, {transform_indices = @transform_3, window_bounds = array<i64: 8, 512>}]} {
    %c0 = arith.constant 0 : index
    %c0_0 = arith.constant 0 : index
    %0 = vector.load %arg1[%c0, %c0_0] : memref<8x1024xf32, #tpu.memory_space<vmem>>, vector<8x1024xf32>
    %c0_1 = arith.constant 0 : index
    %c0_2 = arith.constant 0 : index
    %1 = vector.load %arg2[%c0_1, %c0_2] : memref<512x1024xf32, #tpu.memory_space<vmem>>, vector<512x1024xf32>
    %cst = arith.constant dense<0.000000e+00> : vector<8x512xf32>
    %2 = tpu.matmul %0, %1, %cst {dimension_numbers = #tpu.dot_dimension_numbers<[1], [1], [0], [0], [0, 0, 1, 0], [], []>} : vector<8x1024xf32>, vector<512x1024xf32>, vector<8x512xf32> -> vector<8x512xf32>
    %c0_3 = arith.constant 0 : index
    %c0_4 = arith.constant 0 : index
    %3 = vector.load %arg3[%c0_3, %c0_4] : memref<1x512xf32, #tpu.memory_space<vmem>>, vector<1x512xf32>
    %4 = vector.broadcast %3 : vector<1x512xf32> to vector<8x512xf32>
    %5 = arith.addf %2, %4 : vector<8x512xf32>
    %c0_5 = arith.constant 0 : index
    %c0_6 = arith.constant 0 : index
    %6 = vector.load %arg4[%c0_5, %c0_6] : memref<8x512xf32, #tpu.memory_space<vmem>>, vector<8x512xf32>
    tpu.vector_store %arg4[%c0_5, %c0_6], %5 {strides = array<i32>} : memref<8x512xf32, #tpu.memory_space<vmem>>, vector<8x512xf32>,
    return
  }
  func.func @transform_0(%arg0: i32) -> (i32, i32) {
    %c0_i32 = arith.constant 0 : i32
    %c0_i32_0 = arith.constant 0 : i32
    return %arg0, %c0_i32 : i32, i32
  }
  func.func @transform_1(%arg0: i32) -> (i32, i32) {
    %c0_i32 = arith.constant 0 : i32
    %c0_i32_0 = arith.constant 0 : i32
    %c0_i32_1 = arith.constant 0 : i32
    return %c0_i32, %c0_i32_0 : i32, i32
  }
  func.func @transform_2(%arg0: i32) -> (i32, i32) {
    %c0_i32 = arith.constant 0 : i32
    %c0_i32_0 = arith.constant 0 : i32
    %c0_i32_1 = arith.constant 0 : i32
    return %c0_i32, %c0_i32_0 : i32, i32
  }
  func.func @transform_3(%arg0: i32) -> (i32, i32) {
    %c0_i32 = arith.constant 0 : i32
    %c0_i32_0 = arith.constant 0 : i32
    return %arg0, %c0_i32 : i32, i32
  }
}

</mosaic_0001>

<bundles_post_ra>
// kernel: fc_layer.1
= control target key start
LH: loop header
LB: loop body
LE: loop exit
PB: predicated region body
PF: predicated region fallthrough
CT: control target
= control target key end

     0   :  { %8 = vsyncpa [#allocation3], 0  ;;  %s1318_s0 = inlined_call_operand.vmem [shape: f32[8,1024], index: 0, kind: input, shape index: {}]   ;;  %s1319_s1 = inlined_call_operand.hbm [shape: f32[512,1024], index: 1, kind: input, shape index: {}]   ;;  %s1320_s2 = inlined_call_operand.hbm [shape: f32[1,512], index: 2, kind: input, shape index: {}]   ;;  %s1321_s3 = inlined_call_operand.vmem [shape: f32[8,512], index: 3, kind: output, shape index: {}]  }
   0x1   :  { %9 = vsyncpa [#allocation5], 0  ;;  %s1214_s12 = smov [#allocation2]  }
   0x2   :  { %s17_s13 = sshll.u32 %s1214_s12, 4  ;;  %s18_s13 = int_to_ptr.vmem [resolvable:$true] %s17_s13 }
   0x3   :  { %s1178_s14 = scalar_lea.vmem %s18_s13, 65536  ;;  %p1183_p1 = scmp.lt.s32.totalorder %s18_s13, %s18_s13 }
   0x4   :  { %p1179_p0 = scmp.ne.s32.totalorder %s18_s13, %s1178_s14  ;;  %p1184_p2 = scmp.lt.s32.totalorder %s1178_s14, %s1178_s14 }
   0x6   :  { %p1185_p3 = por %p1184_p2, %p1183_p1 }
   0x8   :  { %p1186_p4 = pnand %p1185_p3, %p1179_p0 }
   0xa   :  { %1189 = shalt.err (!%p1186_p4)
}
   0xb   :  { %s1215_s15 = smov 1024   ;;  %s1216_s16 = smov 64  }
   0xc   :  { %23 = dma.hbm_to_vmem [thread:$0]  %s1319_s1, 65536, %s18_s13, [#allocation3], %s1215_s15, %s1215_s15, %s1216_s16  }
   0xd   :  { %s1217_s19 = smov [#allocation4]  }
   0xe   :  { %s30_s20 = sshll.u32 %s1217_s19, 4  ;;  %s31_s20 = int_to_ptr.vmem [resolvable:$true] %s30_s20 }
   0xf   :  { %s1198_s21 = scalar_lea.vmem %s31_s20, 64  ;;  %p1203_p6 = scmp.lt.s32.totalorder %s31_s20, %s31_s20 }
  0x10   :  { %p1199_p5 = scmp.ne.s32.totalorder %s31_s20, %s1198_s21  ;;  %p1204_p7 = scmp.lt.s32.totalorder %s1198_s21, %s1198_s21 }
  0x12   :  { %p1205_p8 = por %p1204_p7, %p1203_p6 }
  0x14   :  { %p1206_p9 = pnand %p1205_p8, %p1199_p5 }
  0x16   :  { %1209 = shalt.err (!%p1206_p9)
}
  0x17   :  { %33 = dma.hbm_to_vmem [thread:$0]  %s1320_s2, 64, %s31_s20, [#allocation5]  }
  0x18   :  { %1210 = dma.done.wait [#allocation3], 65536  }
  0x19   :  { %1211 = vsyncadd [#allocation3], 4294901760 }
  0x1a   :  { %1212 = dma.done.wait [#allocation5], 64  }
  0x1b   :  { %1213 = vsyncadd [#allocation5], 4294967232  ;;  %v169_v0 = vld [vmem:[#allocation2 + $0x3c8] sm:$0xff]  ;;  %v171_v1 = vld [vmem:[#allocation2 + $0x3d8] sm:$0xff] }
  0x1c   :  { %v168_v2 = vld [vmem:[#allocation2 + $0x3c0] sm:$0xff]  ;;  %582 = vmatprep.subr.mxu0 %v169_v0  ;;  %653 = vmatprep.subr.mxu1 %v171_v1  ;;  %v170_v3 = vld [vmem:[#allocation2 + $0x3d0] sm:$0xff]  ;;  %v161_v4 = vld [vmem:[#allocation2 + $0x388] sm:$0xff] }
  0x1d   :  { %v163_v5 = vld [vmem:[#allocation2 + $0x398] sm:$0xff]  ;;  %583 = vmatpush1.xpose.msra.mxu0 %v168_v2  ;;  %654 = vmatpush1.xpose.msra.mxu1 %v170_v3  ;;  %v160_v6 = vld [vmem:[#allocation2 + $0x380] sm:$0xff]  ;;  %v162_v7 = vld [vmem:[#allocation2 + $0x390] sm:$0xff] }
  0x1e   :  { %584 = vmatprep.subr.mxu0 %v161_v4  ;;  %655 = vmatprep.subr.mxu1 %v163_v5  ;;  %v153_v8 = vld [vmem:[#allocation2 + $0x348] sm:$0xff]  ;;  %v155_v9 = vld [vmem:[#allocation2 + $0x358] sm:$0xff]  ;;  %v152_v10 = vld [vmem:[#allocation2 + $0x340] sm:$0xff] }
  0x1f   :  { %v154_v11 = vld [vmem:[#allocation2 + $0x350] sm:$0xff]  ;;  %v145_v12 = vld [vmem:[#allocation2 + $0x308] sm:$0xff]  ;;  %v147_v13 = vld [vmem:[#allocation2 + $0x318] sm:$0xff] }
  0x20   :  { %v144_v14 = vld [vmem:[#allocation2 + $0x300] sm:$0xff]  ;;  %v146_v15 = vld [vmem:[#allocation2 + $0x310] sm:$0xff]  ;;  %v137_v16 = vld [vmem:[#allocation2 + $0x2c8] sm:$0xff] }
  0x21   :  { %585 = vmatpush1.xpose.msra.mxu0 %v160_v6  ;;  %656 = vmatpush1.xpose.msra.mxu1 %v162_v7  ;;  %v139_v17 = vld [vmem:[#allocation2 + $0x2d8] sm:$0xff]  ;;  %v136_v18 = vld [vmem:[#allocation2 + $0x2c0] sm:$0xff]  ;;  %v138_v19 = vld [vmem:[#allocation2 + $0x2d0] sm:$0xff] }
  0x22   :  { %586 = vmatprep.subr.mxu0 %v153_v8  ;;  %657 = vmatprep.subr.mxu1 %v155_v9  ;;  %v129_v20 = vld [vmem:[#allocation2 + $0x288] sm:$0xff]  ;;  %v131_v21 = vld [vmem:[#allocation2 + $0x298] sm:$0xff]  ;;  %v128_v22 = vld [vmem:[#allocation2 + $0x280] sm:$0xff] }
  0x23   :  { %v130_v23 = vld [vmem:[#allocation2 + $0x290] sm:$0xff]  ;;  %v121_v24 = vld [vmem:[#allocation2 + $0x248] sm:$0xff]  ;;  %v123_v25 = vld [vmem:[#allocation2 + $0x258] sm:$0xff] }
  0x24   :  { %v120_v26 = vld [vmem:[#allocation2 + $0x240] sm:$0xff]  ;;  %v122_v27 = vld [vmem:[#allocation2 + $0x250] sm:$0xff]  ;;  %v113_v28 = vld [vmem:[#allocation2 + $0x208] sm:$0xff] }
  0x25   :  { %587 = vmatpush1.xpose.msra.mxu0 %v152_v10  ;;  %658 = vmatpush1.xpose.msra.mxu1 %v154_v11  ;;  %v115_v29 = vld [vmem:[#allocation2 + $0x218] sm:$0xff]  ;;  %v112_v30 = vld [vmem:[#allocation2 + $0x200] sm:$0xff]  ;;  %v114_v31 = vld [vmem:[#allocation2 + $0x210] sm:$0xff] }
  0x26   :  { %588 = vmatprep.subr.mxu0 %v145_v12  ;;  %659 = vmatprep.subr.mxu1 %v147_v13  ;;  %v105_v32 = vld [vmem:[#allocation2 + $0x1c8] sm:$0xff]  ;;  %v107_v33 = vld [vmem:[#allocation2 + $0x1d8] sm:$0xff]  ;;  %v104_v34 = vld [vmem:[#allocation2 + $0x1c0] sm:$0xff] }
  0x27   :  { %v106_v35 = vld [vmem:[#allocation2 + $0x1d0] sm:$0xff]  ;;  %v97_v36 = vld [vmem:[#allocation2 + $0x188] sm:$0xff]  ;;  %v99_v37 = vld [vmem:[#allocation2 + $0x198] sm:$0xff] }
  0x28   :  { %v96_v38 = vld [vmem:[#allocation2 + $0x180] sm:$0xff]  ;;  %v98_v39 = vld [vmem:[#allocation2 + $0x190] sm:$0xff]  ;;  %v89_v40 = vld [vmem:[#allocation2 + $0x148] sm:$0xff] }
  0x29   :  { %589 = vmatpush1.xpose.msra.mxu0 %v144_v14  ;;  %660 = vmatpush1.xpose.msra.mxu1 %v146_v15  ;;  %v91_v41 = vld [vmem:[#allocation2 + $0x158] sm:$0xff]  ;;  %v88_v42 = vld [vmem:[#allocation2 + $0x140] sm:$0xff]  ;;  %v90_v43 = vld [vmem:[#allocation2 + $0x150] sm:$0xff] }
  0x2a   :  { %590 = vmatprep.subr.mxu0 %v137_v16  ;;  %661 = vmatprep.subr.mxu1 %v139_v17  ;;  %v81_v44 = vld [vmem:[#allocation2 + $0x108] sm:$0xff]  ;;  %v83_v45 = vld [vmem:[#allocation2 + $0x118] sm:$0xff]  ;;  %v80_v47 = vld [vmem:[#allocation2 + $0x100] sm:$0xff] }
  0x2b   :  { %v1247_v46 = vld [vmem:[%s1318_s0 + $0x8] sm:$0xff]  ;;  %v82_v48 = vld [vmem:[#allocation2 + $0x110] sm:$0xff]  ;;  %v1252_v49 = vld [vmem:[%s1318_s0 + $0x18] sm:$0xff] }
  0x2c   :  { %v73_v50 = vld [vmem:[#allocation2 + $0xc8] sm:$0xff]  ;;  %v75_v51 = vld [vmem:[#allocation2 + $0xd8] sm:$0xff]  ;;  %646 = vmatprep.mubr.f32.mxu0 %v1247_v46  ;;  %717 = vmatprep.mubr.f32.mxu1 %v1252_v49  ;;  %v72_v52 = vld [vmem:[#allocation2 + $0xc0] sm:$0xff] }
  0x2d   :  { %591 = vmatpush1.xpose.msra.mxu0 %v136_v18  ;;  %662 = vmatpush1.xpose.msra.mxu1 %v138_v19  ;;  %v74_v53 = vld [vmem:[#allocation2 + $0xd0] sm:$0xff]  ;;  %v65_v54 = vld [vmem:[#allocation2 + $0x88] sm:$0xff]  ;;  %v67_v55 = vld [vmem:[#allocation2 + $0x98] sm:$0xff] }
  0x2e   :  { %592 = vmatprep.subr.mxu0 %v129_v20  ;;  %663 = vmatprep.subr.mxu1 %v131_v21  ;;  %v64_v56 = vld [vmem:[#allocation2 + $0x80] sm:$0xff]  ;;  %v66_v57 = vld [vmem:[#allocation2 + $0x90] sm:$0xff]  ;;  %v57_v58 = vld [vmem:[#allocation2 + $0x48] sm:$0xff] }
  0x2f   :  { %v59_v59 = vld [vmem:[#allocation2 + $0x58] sm:$0xff]  ;;  %v56_v60 = vld [vmem:[#allocation2 + $0x40] sm:$0xff]  ;;  %v58_v61 = vld [vmem:[#allocation2 + $0x50] sm:$0xff] }
  0x30   :  { %v49_v62 = vld [vmem:[#allocation2 + $0x8] sm:$0xff]  ;;  %v51_v63 = vld [vmem:[#allocation2 + $0x18] sm:$0xff]  ;;  %v48_v0 = vld [vmem:[#allocation2] sm:$0xff] }
  0x31   :  { %593 = vmatpush1.xpose.msra.mxu0 %v128_v22  ;;  %664 = vmatpush1.xpose.msra.mxu1 %v130_v23  ;;  %v50_v1 = vld [vmem:[#allocation2 + $0x10] sm:$0xff]  ;;  %v297_v2 = vld [vmem:[#allocation2 + $0x7c8] sm:$0xff]  ;;  %v299_v3 = vld [vmem:[#allocation2 + $0x7d8] sm:$0xff] }
  0x32   :  { %594 = vmatprep.subr.mxu0 %v121_v24  ;;  %665 = vmatprep.subr.mxu1 %v123_v25  ;;  %v296_v4 = vld [vmem:[#allocation2 + $0x7c0] sm:$0xff]  ;;  %v298_v5 = vld [vmem:[#allocation2 + $0x7d0] sm:$0xff]  ;;  %v289_v6 = vld [vmem:[#allocation2 + $0x788] sm:$0xff] }
  0x33   :  { %v291_v7 = vld [vmem:[#allocation2 + $0x798] sm:$0xff]  ;;  %v288_v8 = vld [vmem:[#allocation2 + $0x780] sm:$0xff]  ;;  %v290_v9 = vld [vmem:[#allocation2 + $0x790] sm:$0xff] }
  0x34   :  { %v281_v10 = vld [vmem:[#allocation2 + $0x748] sm:$0xff]  ;;  %v283_v11 = vld [vmem:[#allocation2 + $0x758] sm:$0xff]  ;;  %v280_v12 = vld [vmem:[#allocation2 + $0x740] sm:$0xff] }
  0x35   :  { %595 = vmatpush1.xpose.msra.mxu0 %v120_v26  ;;  %666 = vmatpush1.xpose.msra.mxu1 %v122_v27  ;;  %v282_v13 = vld [vmem:[#allocation2 + $0x750] sm:$0xff]  ;;  %v273_v14 = vld [vmem:[#allocation2 + $0x708] sm:$0xff]  ;;  %v275_v15 = vld [vmem:[#allocation2 + $0x718] sm:$0xff] }
  0x36   :  { %596 = vmatprep.subr.mxu0 %v113_v28  ;;  %667 = vmatprep.subr.mxu1 %v115_v29  ;;  %v272_v16 = vld [vmem:[#allocation2 + $0x700] sm:$0xff]  ;;  %v274_v17 = vld [vmem:[#allocation2 + $0x710] sm:$0xff]  ;;  %v265_v18 = vld [vmem:[#allocation2 + $0x6c8] sm:$0xff] }
  0x37   :  { %v267_v19 = vld [vmem:[#allocation2 + $0x6d8] sm:$0xff]  ;;  %v264_v20 = vld [vmem:[#allocation2 + $0x6c0] sm:$0xff]  ;;  %v266_v21 = vld [vmem:[#allocation2 + $0x6d0] sm:$0xff] }
  0x38   :  { %v257_v22 = vld [vmem:[#allocation2 + $0x688] sm:$0xff]  ;;  %v259_v23 = vld [vmem:[#allocation2 + $0x698] sm:$0xff]  ;;  %v256_v24 = vld [vmem:[#allocation2 + $0x680] sm:$0xff] }
  0x39   :  { %597 = vmatpush1.xpose.msra.mxu0 %v112_v30  ;;  %668 = vmatpush1.xpose.msra.mxu1 %v114_v31  ;;  %v258_v25 = vld [vmem:[#allocation2 + $0x690] sm:$0xff]  ;;  %v249_v26 = vld [vmem:[#allocation2 + $0x648] sm:$0xff]  ;;  %v251_v27 = vld [vmem:[#allocation2 + $0x658] sm:$0xff] }
  0x3a   :  { %598 = vmatprep.subr.mxu0 %v105_v32  ;;  %669 = vmatprep.subr.mxu1 %v107_v33  ;;  %v248_v28 = vld [vmem:[#allocation2 + $0x640] sm:$0xff]  ;;  %v250_v29 = vld [vmem:[#allocation2 + $0x650] sm:$0xff]  ;;  %v241_v30 = vld [vmem:[#allocation2 + $0x608] sm:$0xff] }
  0x3b   :  { %v243_v31 = vld [vmem:[#allocation2 + $0x618] sm:$0xff]  ;;  %v240_v32 = vld [vmem:[#allocation2 + $0x600] sm:$0xff]  ;;  %v242_v33 = vld [vmem:[#allocation2 + $0x610] sm:$0xff] }
  0x3d   :  { %599 = vmatpush1.xpose.msra.mxu0 %v104_v34  ;;  %670 = vmatpush1.xpose.msra.mxu1 %v106_v35  ;;  %v233_v34 = vld [vmem:[#allocation2 + $0x5c8] sm:$0xff]  ;;  %v235_v35 = vld [vmem:[#allocation2 + $0x5d8] sm:$0xff] }
  0x3e   :  { %600 = vmatprep.subr.mxu0 %v97_v36  ;;  %671 = vmatprep.subr.mxu1 %v99_v37  ;;  %v232_v36 = vld [vmem:[#allocation2 + $0x5c0] sm:$0xff]  ;;  %v234_v37 = vld [vmem:[#allocation2 + $0x5d0] sm:$0xff] }
  0x41   :  { %601 = vmatpush1.xpose.msra.mxu0 %v96_v38  ;;  %672 = vmatpush1.xpose.msra.mxu1 %v98_v39  ;;  %v225_v38 = vld [vmem:[#allocation2 + $0x588] sm:$0xff]  ;;  %v227_v39 = vld [vmem:[#allocation2 + $0x598] sm:$0xff] }
  0x42   :  { %602 = vmatprep.subr.mxu0 %v89_v40  ;;  %673 = vmatprep.subr.mxu1 %v91_v41  ;;  %v224_v40 = vld [vmem:[#allocation2 + $0x580] sm:$0xff]  ;;  %v226_v41 = vld [vmem:[#allocation2 + $0x590] sm:$0xff] }
  0x45   :  { %603 = vmatpush1.xpose.msra.mxu0 %v88_v42  ;;  %674 = vmatpush1.xpose.msra.mxu1 %v90_v43  ;;  %v217_v42 = vld [vmem:[#allocation2 + $0x548] sm:$0xff]  ;;  %v219_v43 = vld [vmem:[#allocation2 + $0x558] sm:$0xff] }
  0x46   :  { %604 = vmatprep.subr.mxu0 %v81_v44  ;;  %675 = vmatprep.subr.mxu1 %v83_v45  ;;  %v216_v44 = vld [vmem:[#allocation2 + $0x540] sm:$0xff]  ;;  %v218_v45 = vld [vmem:[#allocation2 + $0x550] sm:$0xff] }
  0x49   :  { %605 = vmatpush1.xpose.msra.mxu0 %v80_v47  ;;  %676 = vmatpush1.xpose.msra.mxu1 %v82_v48  ;;  %v209_v47 = vld [vmem:[#allocation2 + $0x508] sm:$0xff]  ;;  %v211_v48 = vld [vmem:[#allocation2 + $0x518] sm:$0xff] }
  0x4a   :  { %606 = vmatprep.subr.mxu0 %v73_v50  ;;  %677 = vmatprep.subr.mxu1 %v75_v51  ;;  %v208_v50 = vld [vmem:[#allocation2 + $0x500] sm:$0xff]  ;;  %v210_v51 = vld [vmem:[#allocation2 + $0x510] sm:$0xff] }
  0x4d   :  { %607 = vmatpush1.xpose.msra.mxu0 %v72_v52  ;;  %678 = vmatpush1.xpose.msra.mxu1 %v74_v53  ;;  %v201_v52 = vld [vmem:[#allocation2 + $0x4c8] sm:$0xff]  ;;  %v203_v53 = vld [vmem:[#allocation2 + $0x4d8] sm:$0xff] }
  0x4e   :  { %608 = vmatprep.subr.mxu0 %v65_v54  ;;  %679 = vmatprep.subr.mxu1 %v67_v55  ;;  %v200_v54 = vld [vmem:[#allocation2 + $0x4c0] sm:$0xff]  ;;  %v202_v55 = vld [vmem:[#allocation2 + $0x4d0] sm:$0xff] }
  0x51   :  { %609 = vmatpush1.xpose.msra.mxu0 %v64_v56  ;;  %680 = vmatpush1.xpose.msra.mxu1 %v66_v57  ;;  %v193_v56 = vld [vmem:[#allocation2 + $0x488] sm:$0xff]  ;;  %v195_v57 = vld [vmem:[#allocation2 + $0x498] sm:$0xff] }
  0x52   :  { %610 = vmatprep.subr.mxu0 %v57_v58  ;;  %681 = vmatprep.subr.mxu1 %v59_v59  ;;  %v192_v58 = vld [vmem:[#allocation2 + $0x480] sm:$0xff]  ;;  %v194_v59 = vld [vmem:[#allocation2 + $0x490] sm:$0xff] }
  0x55   :  { %611 = vmatpush1.xpose.msra.mxu0 %v56_v60  ;;  %682 = vmatpush1.xpose.msra.mxu1 %v58_v61  ;;  %v185_v60 = vld [vmem:[#allocation2 + $0x448] sm:$0xff]  ;;  %v187_v61 = vld [vmem:[#allocation2 + $0x458] sm:$0xff] }
  0x56   :  { %612 = vmatprep.subr.mxu0 %v49_v62  ;;  %683 = vmatprep.subr.mxu1 %v51_v63  ;;  %v184_v62 = vld [vmem:[#allocation2 + $0x440] sm:$0xff]  ;;  %v186_v63 = vld [vmem:[#allocation2 + $0x450] sm:$0xff] }
  0x59   :  { %613 = vmatpush1.xpose.msra.mxu0 %v48_v0  ;;  %684 = vmatpush1.xpose.msra.mxu1 %v50_v1  ;;  %v177_v0 = vld [vmem:[#allocation2 + $0x408] sm:$0xff]  ;;  %v179_v1 = vld [vmem:[#allocation2 + $0x418] sm:$0xff] }
  0x5a   :  { %614 = vmatprep.subr.mxu0 %v297_v2  ;;  %685 = vmatprep.subr.mxu1 %v299_v3  ;;  %v176_v2 = vld [vmem:[#allocation2 + $0x400] sm:$0xff]  ;;  %v178_v3 = vld [vmem:[#allocation2 + $0x410] sm:$0xff] }
  0x5d   :  { %615 = vmatpush2.xpose.msra.mxu0 %v296_v4  ;;  %686 = vmatpush2.xpose.msra.mxu1 %v298_v5  ;;  %v173_v4 = vld [vmem:[#allocation2 + $0x3e8] sm:$0xff]  ;;  %v175_v5 = vld [vmem:[#allocation2 + $0x3f8] sm:$0xff] }
  0x5e   :  { %616 = vmatprep.subr.mxu0 %v289_v6  ;;  %687 = vmatprep.subr.mxu1 %v291_v7  ;;  %v40_v6 = vld [vmem:[%s1318_s0] sm:$0xff]  ;;  %v42_v7 = vld [vmem:[%s1318_s0 + $0x10] sm:$0xff] }
  0x61   :  { %617 = vmatpush2.xpose.msra.mxu0 %v288_v8  ;;  %688 = vmatpush2.xpose.msra.mxu1 %v290_v9  ;;  %v172_v8 = vld [vmem:[#allocation2 + $0x3e0] sm:$0xff]  ;;  %v174_v9 = vld [vmem:[#allocation2 + $0x3f0] sm:$0xff] }
  0x62   :  { %618 = vmatprep.subr.mxu0 %v281_v10  ;;  %689 = vmatprep.subr.mxu1 %v283_v11  ;;  %v165_v10 = vld [vmem:[#allocation2 + $0x3a8] sm:$0xff]  ;;  %v167_v11 = vld [vmem:[#allocation2 + $0x3b8] sm:$0xff] }
  0x65   :  { %619 = vmatpush2.xpose.msra.mxu0 %v280_v12  ;;  %690 = vmatpush2.xpose.msra.mxu1 %v282_v13  ;;  %v45_v12 = vld [vmem:[%s1318_s0 + $0x28] sm:$0xff]  ;;  %v47_v13 = vld [vmem:[%s1318_s0 + $0x38] sm:$0xff] }
  0x66   :  { %620 = vmatprep.subr.mxu0 %v273_v14  ;;  %691 = vmatprep.subr.mxu1 %v275_v15  ;;  %v164_v14 = vld [vmem:[#allocation2 + $0x3a0] sm:$0xff]  ;;  %v166_v15 = vld [vmem:[#allocation2 + $0x3b0] sm:$0xff] }
  0x69   :  { %621 = vmatpush2.xpose.msra.mxu0 %v272_v16  ;;  %692 = vmatpush2.xpose.msra.mxu1 %v274_v17  ;;  %v157_v16 = vld [vmem:[#allocation2 + $0x368] sm:$0xff]  ;;  %v159_v17 = vld [vmem:[#allocation2 + $0x378] sm:$0xff] }
  0x6a   :  { %622 = vmatprep.subr.mxu0 %v265_v18  ;;  %693 = vmatprep.subr.mxu1 %v267_v19  ;;  %v156_v18 = vld [vmem:[#allocation2 + $0x360] sm:$0xff]  ;;  %v158_v19 = vld [vmem:[#allocation2 + $0x370] sm:$0xff] }
  0x6d   :  { %623 = vmatpush2.xpose.msra.mxu0 %v264_v20  ;;  %694 = vmatpush2.xpose.msra.mxu1 %v266_v21  ;;  %v149_v20 = vld [vmem:[#allocation2 + $0x328] sm:$0xff]  ;;  %v151_v21 = vld [vmem:[#allocation2 + $0x338] sm:$0xff] }
  0x6e   :  { %624 = vmatprep.subr.mxu0 %v257_v22  ;;  %695 = vmatprep.subr.mxu1 %v259_v23  ;;  %v148_v22 = vld [vmem:[#allocation2 + $0x320] sm:$0xff]  ;;  %v150_v23 = vld [vmem:[#allocation2 + $0x330] sm:$0xff] }
  0x71   :  { %625 = vmatpush2.xpose.msra.mxu0 %v256_v24  ;;  %696 = vmatpush2.xpose.msra.mxu1 %v258_v25  ;;  %v141_v24 = vld [vmem:[#allocation2 + $0x2e8] sm:$0xff]  ;;  %v143_v25 = vld [vmem:[#allocation2 + $0x2f8] sm:$0xff] }
  0x72   :  { %626 = vmatprep.subr.mxu0 %v249_v26  ;;  %697 = vmatprep.subr.mxu1 %v251_v27  ;;  %v140_v26 = vld [vmem:[#allocation2 + $0x2e0] sm:$0xff]  ;;  %v142_v27 = vld [vmem:[#allocation2 + $0x2f0] sm:$0xff] }
  0x75   :  { %627 = vmatpush2.xpose.msra.mxu0 %v248_v28  ;;  %698 = vmatpush2.xpose.msra.mxu1 %v250_v29  ;;  %v133_v28 = vld [vmem:[#allocation2 + $0x2a8] sm:$0xff]  ;;  %v135_v29 = vld [vmem:[#allocation2 + $0x2b8] sm:$0xff] }
  0x76   :  { %628 = vmatprep.subr.mxu0 %v241_v30  ;;  %699 = vmatprep.subr.mxu1 %v243_v31  ;;  %v132_v30 = vld [vmem:[#allocation2 + $0x2a0] sm:$0xff]  ;;  %v134_v31 = vld [vmem:[#allocation2 + $0x2b0] sm:$0xff] }
  0x79   :  { %629 = vmatpush2.xpose.msra.mxu0 %v240_v32  ;;  %700 = vmatpush2.xpose.msra.mxu1 %v242_v33  ;;  %v125_v32 = vld [vmem:[#allocation2 + $0x268] sm:$0xff]  ;;  %v127_v33 = vld [vmem:[#allocation2 + $0x278] sm:$0xff] }
  0x7a   :  { %630 = vmatprep.subr.mxu0 %v233_v34  ;;  %701 = vmatprep.subr.mxu1 %v235_v35  ;;  %v124_v34 = vld [vmem:[#allocation2 + $0x260] sm:$0xff]  ;;  %v126_v35 = vld [vmem:[#allocation2 + $0x270] sm:$0xff] }
  0x7d   :  { %631 = vmatpush2.xpose.msra.mxu0 %v232_v36  ;;  %702 = vmatpush2.xpose.msra.mxu1 %v234_v37  ;;  %v117_v36 = vld [vmem:[#allocation2 + $0x228] sm:$0xff]  ;;  %v119_v37 = vld [vmem:[#allocation2 + $0x238] sm:$0xff] }
  0x7e   :  { %632 = vmatprep.subr.mxu0 %v225_v38  ;;  %703 = vmatprep.subr.mxu1 %v227_v39  ;;  %v116_v38 = vld [vmem:[#allocation2 + $0x220] sm:$0xff]  ;;  %v118_v39 = vld [vmem:[#allocation2 + $0x230] sm:$0xff] }
  0x81   :  { %633 = vmatpush2.xpose.msra.mxu0 %v224_v40  ;;  %704 = vmatpush2.xpose.msra.mxu1 %v226_v41  ;;  %v109_v40 = vld [vmem:[#allocation2 + $0x1e8] sm:$0xff]  ;;  %v111_v41 = vld [vmem:[#allocation2 + $0x1f8] sm:$0xff] }
  0x82   :  { %634 = vmatprep.subr.mxu0 %v217_v42  ;;  %705 = vmatprep.subr.mxu1 %v219_v43  ;;  %v108_v42 = vld [vmem:[#allocation2 + $0x1e0] sm:$0xff]  ;;  %v110_v43 = vld [vmem:[#allocation2 + $0x1f0] sm:$0xff] }
  0x85   :  { %635 = vmatpush2.xpose.msra.mxu0 %v216_v44  ;;  %706 = vmatpush2.xpose.msra.mxu1 %v218_v45  ;;  %v101_v44 = vld [vmem:[#allocation2 + $0x1a8] sm:$0xff]  ;;  %v103_v45 = vld [vmem:[#allocation2 + $0x1b8] sm:$0xff] }
  0x86   :  { %636 = vmatprep.subr.mxu0 %v209_v47  ;;  %707 = vmatprep.subr.mxu1 %v211_v48  ;;  %v100_v47 = vld [vmem:[#allocation2 + $0x1a0] sm:$0xff]  ;;  %v102_v48 = vld [vmem:[#allocation2 + $0x1b0] sm:$0xff] }
  0x89   :  { %637 = vmatpush2.xpose.msra.mxu0 %v208_v50  ;;  %708 = vmatpush2.xpose.msra.mxu1 %v210_v51  ;;  %v93_v50 = vld [vmem:[#allocation2 + $0x168] sm:$0xff]  ;;  %v95_v51 = vld [vmem:[#allocation2 + $0x178] sm:$0xff] }
  0x8a   :  { %638 = vmatprep.subr.mxu0 %v201_v52  ;;  %709 = vmatprep.subr.mxu1 %v203_v53  ;;  %v92_v52 = vld [vmem:[#allocation2 + $0x160] sm:$0xff]  ;;  %v94_v53 = vld [vmem:[#allocation2 + $0x170] sm:$0xff] }
  0x8d   :  { %639 = vmatpush2.xpose.msra.mxu0 %v200_v54  ;;  %710 = vmatpush2.xpose.msra.mxu1 %v202_v55  ;;  %v85_v54 = vld [vmem:[#allocation2 + $0x128] sm:$0xff]  ;;  %v87_v55 = vld [vmem:[#allocation2 + $0x138] sm:$0xff] }
  0x8e   :  { %640 = vmatprep.subr.mxu0 %v193_v56  ;;  %711 = vmatprep.subr.mxu1 %v195_v57  ;;  %v84_v56 = vld [vmem:[#allocation2 + $0x120] sm:$0xff]  ;;  %v86_v57 = vld [vmem:[#allocation2 + $0x130] sm:$0xff] }
  0x91   :  { %641 = vmatpush2.xpose.msra.mxu0 %v192_v58  ;;  %712 = vmatpush2.xpose.msra.mxu1 %v194_v59  ;;  %v77_v58 = vld [vmem:[#allocation2 + $0xe8] sm:$0xff]  ;;  %v79_v59 = vld [vmem:[#allocation2 + $0xf8] sm:$0xff] }
  0x92   :  { %642 = vmatprep.subr.mxu0 %v185_v60  ;;  %713 = vmatprep.subr.mxu1 %v187_v61  ;;  %v76_v60 = vld [vmem:[#allocation2 + $0xe0] sm:$0xff]  ;;  %v78_v61 = vld [vmem:[#allocation2 + $0xf0] sm:$0xff] }
  0x95   :  { %643 = vmatpush2.xpose.msra.mxu0 %v184_v62  ;;  %714 = vmatpush2.xpose.msra.mxu1 %v186_v63  ;;  %v69_v62 = vld [vmem:[#allocation2 + $0xa8] sm:$0xff]  ;;  %v71_v63 = vld [vmem:[#allocation2 + $0xb8] sm:$0xff] }
  0x96   :  { %644 = vmatprep.subr.mxu0 %v177_v0  ;;  %715 = vmatprep.subr.mxu1 %v179_v1  ;;  %v68_v0 = vld [vmem:[#allocation2 + $0xa0] sm:$0xff]  ;;  %v70_v1 = vld [vmem:[#allocation2 + $0xb0] sm:$0xff] }
  0x99   :  { %645 = vmatpush2.xpose.msra.mxu0 %v176_v2  ;;  %716 = vmatpush2.xpose.msra.mxu1 %v178_v3  ;;  %v61_v2 = vld [vmem:[#allocation2 + $0x68] sm:$0xff]  ;;  %v63_v3 = vld [vmem:[#allocation2 + $0x78] sm:$0xff] }
  0x9a   :  { %724 = vmatprep.subr.mxu0 %v173_v4  ;;  %795 = vmatprep.subr.mxu1 %v175_v5  ;;  %v60_v4 = vld [vmem:[#allocation2 + $0x60] sm:$0xff]  ;;  %v62_v5 = vld [vmem:[#allocation2 + $0x70] sm:$0xff] }
  0x9c   :  { %647 = vmatmul.mubr.f32.vlgmr.msra.gmra.mxu0 %v40_v6  ;;  %718 = vmatmul.mubr.f32.vlgmr.msra.gmra.mxu1 %v42_v7  ;;  %v53_v6 = vld [vmem:[#allocation2 + $0x28] sm:$0xff]  ;;  %v55_v7 = vld [vmem:[#allocation2 + $0x38] sm:$0xff] }
  0x9d   :  { %725 = vmatpush1.xpose.msra.mxu0 %v172_v8  ;;  %796 = vmatpush1.xpose.msra.mxu1 %v174_v9  ;;  %v52_v8 = vld [vmem:[#allocation2 + $0x20] sm:$0xff]  ;;  %v54_v9 = vld [vmem:[#allocation2 + $0x30] sm:$0xff] }
  0x9e   :  { %726 = vmatprep.subr.mxu0 %v165_v10  ;;  %797 = vmatprep.subr.mxu1 %v167_v11  ;;  %v301_v10 = vld [vmem:[#allocation2 + $0x7e8] sm:$0xff]  ;;  %v303_v11 = vld [vmem:[#allocation2 + $0x7f8] sm:$0xff] }
  0x9f   :  { %788 = vmatprep.mubr.f32.mxu0 %v45_v12  ;;  %859 = vmatprep.mubr.f32.mxu1 %v47_v13  ;;  %v300_v12 = vld [vmem:[#allocation2 + $0x7e0] sm:$0xff]  ;;  %v302_v13 = vld [vmem:[#allocation2 + $0x7f0] sm:$0xff] }
  0xa1   :  { %727 = vmatpush1.xpose.msra.mxu0 %v164_v14  ;;  %798 = vmatpush1.xpose.msra.mxu1 %v166_v15  ;;  %v293_v14 = vld [vmem:[#allocation2 + $0x7a8] sm:$0xff]  ;;  %v295_v15 = vld [vmem:[#allocation2 + $0x7b8] sm:$0xff] }
  0xa2   :  { %728 = vmatprep.subr.mxu0 %v157_v16  ;;  %799 = vmatprep.subr.mxu1 %v159_v17  ;;  %v292_v16 = vld [vmem:[#allocation2 + $0x7a0] sm:$0xff]  ;;  %v294_v17 = vld [vmem:[#allocation2 + $0x7b0] sm:$0xff] }
  0xa5   :  { %729 = vmatpush1.xpose.msra.mxu0 %v156_v18  ;;  %800 = vmatpush1.xpose.msra.mxu1 %v158_v19  ;;  %v285_v18 = vld [vmem:[#allocation2 + $0x768] sm:$0xff]  ;;  %v287_v19 = vld [vmem:[#allocation2 + $0x778] sm:$0xff] }
  0xa6   :  { %730 = vmatprep.subr.mxu0 %v149_v20  ;;  %801 = vmatprep.subr.mxu1 %v151_v21  ;;  %v284_v20 = vld [vmem:[#allocation2 + $0x760] sm:$0xff]  ;;  %v286_v21 = vld [vmem:[#allocation2 + $0x770] sm:$0xff] }
  0xa9   :  { %731 = vmatpush1.xpose.msra.mxu0 %v148_v22  ;;  %802 = vmatpush1.xpose.msra.mxu1 %v150_v23  ;;  %v277_v22 = vld [vmem:[#allocation2 + $0x728] sm:$0xff]  ;;  %v279_v23 = vld [vmem:[#allocation2 + $0x738] sm:$0xff] }
  0xaa   :  { %732 = vmatprep.subr.mxu0 %v141_v24  ;;  %803 = vmatprep.subr.mxu1 %v143_v25  ;;  %v276_v24 = vld [vmem:[#allocation2 + $0x720] sm:$0xff]  ;;  %v278_v25 = vld [vmem:[#allocation2 + $0x730] sm:$0xff] }
  0xad   :  { %733 = vmatpush1.xpose.msra.mxu0 %v140_v26  ;;  %804 = vmatpush1.xpose.msra.mxu1 %v142_v27  ;;  %v269_v26 = vld [vmem:[#allocation2 + $0x6e8] sm:$0xff]  ;;  %v271_v27 = vld [vmem:[#allocation2 + $0x6f8] sm:$0xff] }
  0xae   :  { %734 = vmatprep.subr.mxu0 %v133_v28  ;;  %805 = vmatprep.subr.mxu1 %v135_v29  ;;  %v268_v28 = vld [vmem:[#allocation2 + $0x6e0] sm:$0xff]  ;;  %v270_v29 = vld [vmem:[#allocation2 + $0x6f0] sm:$0xff] }
  0xb1   :  { %735 = vmatpush1.xpose.msra.mxu0 %v132_v30  ;;  %806 = vmatpush1.xpose.msra.mxu1 %v134_v31  ;;  %v261_v30 = vld [vmem:[#allocation2 + $0x6a8] sm:$0xff]  ;;  %v263_v31 = vld [vmem:[#allocation2 + $0x6b8] sm:$0xff] }
  0xb2   :  { %736 = vmatprep.subr.mxu0 %v125_v32  ;;  %807 = vmatprep.subr.mxu1 %v127_v33  ;;  %v260_v32 = vld [vmem:[#allocation2 + $0x6a0] sm:$0xff]  ;;  %v262_v33 = vld [vmem:[#allocation2 + $0x6b0] sm:$0xff] }
  0xb5   :  { %737 = vmatpush1.xpose.msra.mxu0 %v124_v34  ;;  %808 = vmatpush1.xpose.msra.mxu1 %v126_v35  ;;  %v253_v34 = vld [vmem:[#allocation2 + $0x668] sm:$0xff]  ;;  %v255_v35 = vld [vmem:[#allocation2 + $0x678] sm:$0xff] }
  0xb6   :  { %738 = vmatprep.subr.mxu0 %v117_v36  ;;  %809 = vmatprep.subr.mxu1 %v119_v37  ;;  %v252_v36 = vld [vmem:[#allocation2 + $0x660] sm:$0xff]  ;;  %v254_v37 = vld [vmem:[#allocation2 + $0x670] sm:$0xff] }
  0xb9   :  { %739 = vmatpush1.xpose.msra.mxu0 %v116_v38  ;;  %810 = vmatpush1.xpose.msra.mxu1 %v118_v39  ;;  %v245_v38 = vld [vmem:[#allocation2 + $0x628] sm:$0xff]  ;;  %v247_v39 = vld [vmem:[#allocation2 + $0x638] sm:$0xff] }
  0xba   :  { %740 = vmatprep.subr.mxu0 %v109_v40  ;;  %811 = vmatprep.subr.mxu1 %v111_v41  ;;  %v244_v40 = vld [vmem:[#allocation2 + $0x620] sm:$0xff]  ;;  %v246_v41 = vld [vmem:[#allocation2 + $0x630] sm:$0xff] }
  0xbd   :  { %741 = vmatpush1.xpose.msra.mxu0 %v108_v42  ;;  %812 = vmatpush1.xpose.msra.mxu1 %v110_v43  ;;  %v237_v42 = vld [vmem:[#allocation2 + $0x5e8] sm:$0xff]  ;;  %v239_v43 = vld [vmem:[#allocation2 + $0x5f8] sm:$0xff] }
  0xbe   :  { %742 = vmatprep.subr.mxu0 %v101_v44  ;;  %813 = vmatprep.subr.mxu1 %v103_v45  ;;  %v236_v44 = vld [vmem:[#allocation2 + $0x5e0] sm:$0xff]  ;;  %v238_v45 = vld [vmem:[#allocation2 + $0x5f0] sm:$0xff] }
  0xc1   :  { %743 = vmatpush1.xpose.msra.mxu0 %v100_v47  ;;  %814 = vmatpush1.xpose.msra.mxu1 %v102_v48  ;;  %v229_v47 = vld [vmem:[#allocation2 + $0x5a8] sm:$0xff]  ;;  %v231_v48 = vld [vmem:[#allocation2 + $0x5b8] sm:$0xff] }
  0xc2   :  { %744 = vmatprep.subr.mxu0 %v93_v50  ;;  %815 = vmatprep.subr.mxu1 %v95_v51  ;;  %v228_v50 = vld [vmem:[#allocation2 + $0x5a0] sm:$0xff]  ;;  %v230_v51 = vld [vmem:[#allocation2 + $0x5b0] sm:$0xff] }
  0xc5   :  { %745 = vmatpush1.xpose.msra.mxu0 %v92_v52  ;;  %816 = vmatpush1.xpose.msra.mxu1 %v94_v53  ;;  %v221_v52 = vld [vmem:[#allocation2 + $0x568] sm:$0xff]  ;;  %v223_v53 = vld [vmem:[#allocation2 + $0x578] sm:$0xff] }
  0xc6   :  { %746 = vmatprep.subr.mxu0 %v85_v54  ;;  %817 = vmatprep.subr.mxu1 %v87_v55  ;;  %v220_v54 = vld [vmem:[#allocation2 + $0x560] sm:$0xff]  ;;  %v222_v55 = vld [vmem:[#allocation2 + $0x570] sm:$0xff] }
  0xc9   :  { %747 = vmatpush1.xpose.msra.mxu0 %v84_v56  ;;  %818 = vmatpush1.xpose.msra.mxu1 %v86_v57  ;;  %v213_v56 = vld [vmem:[#allocation2 + $0x528] sm:$0xff]  ;;  %v215_v57 = vld [vmem:[#allocation2 + $0x538] sm:$0xff] }
  0xca   :  { %748 = vmatprep.subr.mxu0 %v77_v58  ;;  %819 = vmatprep.subr.mxu1 %v79_v59  ;;  %v212_v58 = vld [vmem:[#allocation2 + $0x520] sm:$0xff]  ;;  %v214_v59 = vld [vmem:[#allocation2 + $0x530] sm:$0xff] }
  0xcd   :  { %749 = vmatpush1.xpose.msra.mxu0 %v76_v60  ;;  %820 = vmatpush1.xpose.msra.mxu1 %v78_v61  ;;  %v205_v60 = vld [vmem:[#allocation2 + $0x4e8] sm:$0xff]  ;;  %v207_v61 = vld [vmem:[#allocation2 + $0x4f8] sm:$0xff] }
  0xce   :  { %750 = vmatprep.subr.mxu0 %v69_v62  ;;  %821 = vmatprep.subr.mxu1 %v71_v63  ;;  %v204_v62 = vld [vmem:[#allocation2 + $0x4e0] sm:$0xff]  ;;  %v206_v63 = vld [vmem:[#allocation2 + $0x4f0] sm:$0xff] }
  0xd1   :  { %751 = vmatpush1.xpose.msra.mxu0 %v68_v0  ;;  %822 = vmatpush1.xpose.msra.mxu1 %v70_v1  ;;  %v197_v0 = vld [vmem:[#allocation2 + $0x4a8] sm:$0xff]  ;;  %v199_v1 = vld [vmem:[#allocation2 + $0x4b8] sm:$0xff] }
  0xd2   :  { %752 = vmatprep.subr.mxu0 %v61_v2  ;;  %823 = vmatprep.subr.mxu1 %v63_v3  ;;  %v196_v2 = vld [vmem:[#allocation2 + $0x4a0] sm:$0xff]  ;;  %v198_v3 = vld [vmem:[#allocation2 + $0x4b0] sm:$0xff] }
  0xd5   :  { %753 = vmatpush1.xpose.msra.mxu0 %v60_v4  ;;  %824 = vmatpush1.xpose.msra.mxu1 %v62_v5  ;;  %v189_v4 = vld [vmem:[#allocation2 + $0x468] sm:$0xff]  ;;  %v191_v5 = vld [vmem:[#allocation2 + $0x478] sm:$0xff] }
  0xd6   :  { %754 = vmatprep.subr.mxu0 %v53_v6  ;;  %825 = vmatprep.subr.mxu1 %v55_v7  ;;  %v188_v6 = vld [vmem:[#allocation2 + $0x460] sm:$0xff]  ;;  %v190_v7 = vld [vmem:[#allocation2 + $0x470] sm:$0xff] }
  0xd9   :  { %755 = vmatpush1.xpose.msra.mxu0 %v52_v8  ;;  %826 = vmatpush1.xpose.msra.mxu1 %v54_v9  ;;  %v181_v8 = vld [vmem:[#allocation2 + $0x428] sm:$0xff]  ;;  %v183_v9 = vld [vmem:[#allocation2 + $0x438] sm:$0xff] }
  0xda   :  { %756 = vmatprep.subr.mxu0 %v301_v10  ;;  %827 = vmatprep.subr.mxu1 %v303_v11  ;;  %v180_v10 = vld [vmem:[#allocation2 + $0x420] sm:$0xff]  ;;  %v182_v11 = vld [vmem:[#allocation2 + $0x430] sm:$0xff] }
  0xdd   :  { %757 = vmatpush2.xpose.msra.mxu0 %v300_v12  ;;  %828 = vmatpush2.xpose.msra.mxu1 %v302_v13  ;;  %v425_v12 = vld [vmem:[#allocation2 + $0xbc8] sm:$0xff]  ;;  %v427_v13 = vld [vmem:[#allocation2 + $0xbd8] sm:$0xff] }
  0xde   :  { %758 = vmatprep.subr.mxu0 %v293_v14  ;;  %829 = vmatprep.subr.mxu1 %v295_v15  ;;  %v44_v14 = vld [vmem:[%s1318_s0 + $0x20] sm:$0xff]  ;;  %v46_v15 = vld [vmem:[%s1318_s0 + $0x30] sm:$0xff] }
  0xe1   :  { %759 = vmatpush2.xpose.msra.mxu0 %v292_v16  ;;  %830 = vmatpush2.xpose.msra.mxu1 %v294_v17  ;;  %v424_v16 = vld [vmem:[#allocation2 + $0xbc0] sm:$0xff]  ;;  %v426_v17 = vld [vmem:[#allocation2 + $0xbd0] sm:$0xff] }
  0xe2   :  { %760 = vmatprep.subr.mxu0 %v285_v18  ;;  %831 = vmatprep.subr.mxu1 %v287_v19  ;;  %v417_v18 = vld [vmem:[#allocation2 + $0xb88] sm:$0xff]  ;;  %v419_v19 = vld [vmem:[#allocation2 + $0xb98] sm:$0xff] }
  0xe5   :  { %761 = vmatpush2.xpose.msra.mxu0 %v284_v20  ;;  %832 = vmatpush2.xpose.msra.mxu1 %v286_v21  ;;  %v416_v20 = vld [vmem:[#allocation2 + $0xb80] sm:$0xff]  ;;  %v418_v21 = vld [vmem:[#allocation2 + $0xb90] sm:$0xff] }
  0xe6   :  { %762 = vmatprep.subr.mxu0 %v277_v22  ;;  %833 = vmatprep.subr.mxu1 %v279_v23  ;;  %v409_v22 = vld [vmem:[#allocation2 + $0xb48] sm:$0xff]  ;;  %v411_v23 = vld [vmem:[#allocation2 + $0xb58] sm:$0xff] }
  0xe9   :  { %763 = vmatpush2.xpose.msra.mxu0 %v276_v24  ;;  %834 = vmatpush2.xpose.msra.mxu1 %v278_v25  ;;  %v408_v24 = vld [vmem:[#allocation2 + $0xb40] sm:$0xff]  ;;  %v410_v25 = vld [vmem:[#allocation2 + $0xb50] sm:$0xff] }
  0xea   :  { %764 = vmatprep.subr.mxu0 %v269_v26  ;;  %835 = vmatprep.subr.mxu1 %v271_v27  ;;  %v401_v26 = vld [vmem:[#allocation2 + $0xb08] sm:$0xff]  ;;  %v403_v27 = vld [vmem:[#allocation2 + $0xb18] sm:$0xff] }
  0xed   :  { %765 = vmatpush2.xpose.msra.mxu0 %v268_v28  ;;  %836 = vmatpush2.xpose.msra.mxu1 %v270_v29  ;;  %v400_v28 = vld [vmem:[#allocation2 + $0xb00] sm:$0xff]  ;;  %v402_v29 = vld [vmem:[#allocation2 + $0xb10] sm:$0xff] }
  0xee   :  { %766 = vmatprep.subr.mxu0 %v261_v30  ;;  %837 = vmatprep.subr.mxu1 %v263_v31  ;;  %v393_v30 = vld [vmem:[#allocation2 + $0xac8] sm:$0xff]  ;;  %v395_v31 = vld [vmem:[#allocation2 + $0xad8] sm:$0xff] }
  0xf1   :  { %767 = vmatpush2.xpose.msra.mxu0 %v260_v32  ;;  %838 = vmatpush2.xpose.msra.mxu1 %v262_v33  ;;  %v385_v32 = vld [vmem:[#allocation2 + $0xa88] sm:$0xff]  ;;  %v387_v33 = vld [vmem:[#allocation2 + $0xa98] sm:$0xff] }
  0xf2   :  { %768 = vmatprep.subr.mxu0 %v253_v34  ;;  %839 = vmatprep.subr.mxu1 %v255_v35  ;;  %v384_v34 = vld [vmem:[#allocation2 + $0xa80] sm:$0xff]  ;;  %v386_v35 = vld [vmem:[#allocation2 + $0xa90] sm:$0xff] }
  0xf5   :  { %769 = vmatpush2.xpose.msra.mxu0 %v252_v36  ;;  %840 = vmatpush2.xpose.msra.mxu1 %v254_v37  ;;  %v377_v36 = vld [vmem:[#allocation2 + $0xa48] sm:$0xff]  ;;  %v379_v37 = vld [vmem:[#allocation2 + $0xa58] sm:$0xff] }
  0xf6   :  { %770 = vmatprep.subr.mxu0 %v245_v38  ;;  %841 = vmatprep.subr.mxu1 %v247_v39  ;;  %v376_v38 = vld [vmem:[#allocation2 + $0xa40] sm:$0xff]  ;;  %v378_v39 = vld [vmem:[#allocation2 + $0xa50] sm:$0xff] }
  0xf9   :  { %771 = vmatpush2.xpose.msra.mxu0 %v244_v40  ;;  %842 = vmatpush2.xpose.msra.mxu1 %v246_v41  ;;  %v369_v40 = vld [vmem:[#allocation2 + $0xa08] sm:$0xff]  ;;  %v371_v41 = vld [vmem:[#allocation2 + $0xa18] sm:$0xff] }
  0xfa   :  { %772 = vmatprep.subr.mxu0 %v237_v42  ;;  %843 = vmatprep.subr.mxu1 %v239_v43  ;;  %v368_v42 = vld [vmem:[#allocation2 + $0xa00] sm:$0xff]  ;;  %v370_v43 = vld [vmem:[#allocation2 + $0xa10] sm:$0xff] }
  0xfd   :  { %773 = vmatpush2.xpose.msra.mxu0 %v236_v44  ;;  %844 = vmatpush2.xpose.msra.mxu1 %v238_v45  ;;  %v361_v44 = vld [vmem:[#allocation2 + $0x9c8] sm:$0xff]  ;;  %v363_v45 = vld [vmem:[#allocation2 + $0x9d8] sm:$0xff] }
  0xfe   :  { %774 = vmatprep.subr.mxu0 %v229_v47  ;;  %845 = vmatprep.subr.mxu1 %v231_v48  ;;  %v360_v47 = vld [vmem:[#allocation2 + $0x9c0] sm:$0xff]  ;;  %v362_v48 = vld [vmem:[#allocation2 + $0x9d0] sm:$0xff] }
 0x101   :  { %775 = vmatpush2.xpose.msra.mxu0 %v228_v50  ;;  %846 = vmatpush2.xpose.msra.mxu1 %v230_v51  ;;  %v353_v50 = vld [vmem:[#allocation2 + $0x988] sm:$0xff]  ;;  %v355_v51 = vld [vmem:[#allocation2 + $0x998] sm:$0xff] }
 0x102   :  { %776 = vmatprep.subr.mxu0 %v221_v52  ;;  %847 = vmatprep.subr.mxu1 %v223_v53  ;;  %v352_v52 = vld [vmem:[#allocation2 + $0x980] sm:$0xff]  ;;  %v354_v53 = vld [vmem:[#allocation2 + $0x990] sm:$0xff] }
 0x105   :  { %777 = vmatpush2.xpose.msra.mxu0 %v220_v54  ;;  %848 = vmatpush2.xpose.msra.mxu1 %v222_v55  ;;  %v345_v54 = vld [vmem:[#allocation2 + $0x948] sm:$0xff]  ;;  %v347_v55 = vld [vmem:[#allocation2 + $0x958] sm:$0xff] }
 0x106   :  { %778 = vmatprep.subr.mxu0 %v213_v56  ;;  %849 = vmatprep.subr.mxu1 %v215_v57  ;;  %v344_v56 = vld [vmem:[#allocation2 + $0x940] sm:$0xff]  ;;  %v346_v57 = vld [vmem:[#allocation2 + $0x950] sm:$0xff] }
 0x109   :  { %779 = vmatpush2.xpose.msra.mxu0 %v212_v58  ;;  %850 = vmatpush2.xpose.msra.mxu1 %v214_v59  ;;  %v337_v58 = vld [vmem:[#allocation2 + $0x908] sm:$0xff]  ;;  %v339_v59 = vld [vmem:[#allocation2 + $0x918] sm:$0xff] }
 0x10a   :  { %780 = vmatprep.subr.mxu0 %v205_v60  ;;  %851 = vmatprep.subr.mxu1 %v207_v61  ;;  %v336_v60 = vld [vmem:[#allocation2 + $0x900] sm:$0xff]  ;;  %v338_v61 = vld [vmem:[#allocation2 + $0x910] sm:$0xff] }
 0x10d   :  { %781 = vmatpush2.xpose.msra.mxu0 %v204_v62  ;;  %852 = vmatpush2.xpose.msra.mxu1 %v206_v63  ;;  %v329_v62 = vld [vmem:[#allocation2 + $0x8c8] sm:$0xff]  ;;  %v331_v63 = vld [vmem:[#allocation2 + $0x8d8] sm:$0xff] }
 0x10e   :  { %782 = vmatprep.subr.mxu0 %v197_v0  ;;  %853 = vmatprep.subr.mxu1 %v199_v1  ;;  %v328_v0 = vld [vmem:[#allocation2 + $0x8c0] sm:$0xff]  ;;  %v330_v1 = vld [vmem:[#allocation2 + $0x8d0] sm:$0xff] }
 0x111   :  { %783 = vmatpush2.xpose.msra.mxu0 %v196_v2  ;;  %854 = vmatpush2.xpose.msra.mxu1 %v198_v3  ;;  %v321_v2 = vld [vmem:[#allocation2 + $0x888] sm:$0xff]  ;;  %v323_v3 = vld [vmem:[#allocation2 + $0x898] sm:$0xff] }
 0x112   :  { %784 = vmatprep.subr.mxu0 %v189_v4  ;;  %855 = vmatprep.subr.mxu1 %v191_v5  ;;  %v320_v4 = vld [vmem:[#allocation2 + $0x880] sm:$0xff]  ;;  %v322_v5 = vld [vmem:[#allocation2 + $0x890] sm:$0xff] }
 0x115   :  { %785 = vmatpush2.xpose.msra.mxu0 %v188_v6  ;;  %856 = vmatpush2.xpose.msra.mxu1 %v190_v7  ;;  %v313_v6 = vld [vmem:[#allocation2 + $0x848] sm:$0xff]  ;;  %v315_v7 = vld [vmem:[#allocation2 + $0x858] sm:$0xff] }
 0x116   :  { %786 = vmatprep.subr.mxu0 %v181_v8  ;;  %857 = vmatprep.subr.mxu1 %v183_v9  ;;  %v312_v8 = vld [vmem:[#allocation2 + $0x840] sm:$0xff]  ;;  %v314_v9 = vld [vmem:[#allocation2 + $0x850] sm:$0xff] }
 0x119   :  { %787 = vmatpush2.xpose.msra.mxu0 %v180_v10  ;;  %858 = vmatpush2.xpose.msra.mxu1 %v182_v11  ;;  %v305_v10 = vld [vmem:[#allocation2 + $0x808] sm:$0xff]  ;;  %v307_v11 = vld [vmem:[#allocation2 + $0x818] sm:$0xff] }
 0x11a   :  { %866 = vmatprep.subr.mxu0 %v425_v12  ;;  %937 = vmatprep.subr.mxu1 %v427_v13  ;;  %v304_v12 = vld [vmem:[#allocation2 + $0x800] sm:$0xff]  ;;  %v306_v13 = vld [vmem:[#allocation2 + $0x810] sm:$0xff] }
 0x11c   :  { %789 = vmatmul.mubr.f32.vlgmr.msra.gmra.mxu0 %v44_v14  ;;  %860 = vmatmul.mubr.f32.vlgmr.msra.gmra.mxu1 %v46_v15  ;;  %v553_v14 = vld [vmem:[#allocation2 + $0xfc8] sm:$0xff]  ;;  %v555_v15 = vld [vmem:[#allocation2 + $0xfd8] sm:$0xff] }
 0x11d   :  { %867 = vmatpush1.xpose.msra.mxu0 %v424_v16  ;;  %938 = vmatpush1.xpose.msra.mxu1 %v426_v17  ;;  %v552_v16 = vld [vmem:[#allocation2 + $0xfc0] sm:$0xff]  ;;  %v554_v17 = vld [vmem:[#allocation2 + $0xfd0] sm:$0xff] }
 0x11e   :  { %868 = vmatprep.subr.mxu0 %v417_v18  ;;  %939 = vmatprep.subr.mxu1 %v419_v19  ;;  %v545_v18 = vld [vmem:[#allocation2 + $0xf88] sm:$0xff]  ;;  %v547_v19 = vld [vmem:[#allocation2 + $0xf98] sm:$0xff] }
 0x11f   :  { %930 = vmatprep.mubr.f32.mxu0 %v1247_v46  ;;  %1001 = vmatprep.mubr.f32.mxu1 %v1252_v49  ;;  %v392_v46 = vld [vmem:[#allocation2 + $0xac0] sm:$0xff]  ;;  %v394_v49 = vld [vmem:[#allocation2 + $0xad0] sm:$0xff] }
 0x121   :  { %869 = vmatpush1.xpose.msra.mxu0 %v416_v20  ;;  %940 = vmatpush1.xpose.msra.mxu1 %v418_v21  ;;  %v544_v20 = vld [vmem:[#allocation2 + $0xf80] sm:$0xff]  ;;  %v546_v21 = vld [vmem:[#allocation2 + $0xf90] sm:$0xff] }
 0x122   :  { %870 = vmatprep.subr.mxu0 %v409_v22  ;;  %941 = vmatprep.subr.mxu1 %v411_v23  ;;  %v537_v22 = vld [vmem:[#allocation2 + $0xf48] sm:$0xff]  ;;  %v539_v23 = vld [vmem:[#allocation2 + $0xf58] sm:$0xff] }
 0x125   :  { %871 = vmatpush1.xpose.msra.mxu0 %v408_v24  ;;  %942 = vmatpush1.xpose.msra.mxu1 %v410_v25  ;;  %v536_v24 = vld [vmem:[#allocation2 + $0xf40] sm:$0xff]  ;;  %v538_v25 = vld [vmem:[#allocation2 + $0xf50] sm:$0xff] }
 0x126   :  { %872 = vmatprep.subr.mxu0 %v401_v26  ;;  %943 = vmatprep.subr.mxu1 %v403_v27  ;;  %v529_v26 = vld [vmem:[#allocation2 + $0xf08] sm:$0xff]  ;;  %v531_v27 = vld [vmem:[#allocation2 + $0xf18] sm:$0xff] }
 0x129   :  { %873 = vmatpush1.xpose.msra.mxu0 %v400_v28  ;;  %944 = vmatpush1.xpose.msra.mxu1 %v402_v29  ;;  %v528_v28 = vld [vmem:[#allocation2 + $0xf00] sm:$0xff]  ;;  %v530_v29 = vld [vmem:[#allocation2 + $0xf10] sm:$0xff] }
 0x12a   :  { %874 = vmatprep.subr.mxu0 %v393_v30  ;;  %945 = vmatprep.subr.mxu1 %v395_v31  ;;  %v521_v30 = vld [vmem:[#allocation2 + $0xec8] sm:$0xff]  ;;  %v523_v31 = vld [vmem:[#allocation2 + $0xed8] sm:$0xff] }
 0x12d   :  { %875 = vmatpush1.xpose.msra.mxu0 %v392_v46  ;;  %946 = vmatpush1.xpose.msra.mxu1 %v394_v49  ;;  %v520_v46 = vld [vmem:[#allocation2 + $0xec0] sm:$0xff]  ;;  %v522_v49 = vld [vmem:[#allocation2 + $0xed0] sm:$0xff] }
 0x12e   :  { %876 = vmatprep.subr.mxu0 %v385_v32  ;;  %947 = vmatprep.subr.mxu1 %v387_v33  ;;  %v513_v32 = vld [vmem:[#allocation2 + $0xe88] sm:$0xff]  ;;  %v515_v33 = vld [vmem:[#allocation2 + $0xe98] sm:$0xff] }
 0x131   :  { %877 = vmatpush1.xpose.msra.mxu0 %v384_v34  ;;  %948 = vmatpush1.xpose.msra.mxu1 %v386_v35  ;;  %v512_v34 = vld [vmem:[#allocation2 + $0xe80] sm:$0xff]  ;;  %v514_v35 = vld [vmem:[#allocation2 + $0xe90] sm:$0xff] }
 0x132   :  { %878 = vmatprep.subr.mxu0 %v377_v36  ;;  %949 = vmatprep.subr.mxu1 %v379_v37  ;;  %v505_v36 = vld [vmem:[#allocation2 + $0xe48] sm:$0xff]  ;;  %v507_v37 = vld [vmem:[#allocation2 + $0xe58] sm:$0xff] }
 0x135   :  { %879 = vmatpush1.xpose.msra.mxu0 %v376_v38  ;;  %950 = vmatpush1.xpose.msra.mxu1 %v378_v39  ;;  %v504_v38 = vld [vmem:[#allocation2 + $0xe40] sm:$0xff]  ;;  %v506_v39 = vld [vmem:[#allocation2 + $0xe50] sm:$0xff] }
 0x136   :  { %880 = vmatprep.subr.mxu0 %v369_v40  ;;  %951 = vmatprep.subr.mxu1 %v371_v41  ;;  %v497_v40 = vld [vmem:[#allocation2 + $0xe08] sm:$0xff]  ;;  %v499_v41 = vld [vmem:[#allocation2 + $0xe18] sm:$0xff] }
 0x139   :  { %881 = vmatpush1.xpose.msra.mxu0 %v368_v42  ;;  %952 = vmatpush1.xpose.msra.mxu1 %v370_v43  ;;  %v496_v42 = vld [vmem:[#allocation2 + $0xe00] sm:$0xff]  ;;  %v498_v43 = vld [vmem:[#allocation2 + $0xe10] sm:$0xff] }
 0x13a   :  { %882 = vmatprep.subr.mxu0 %v361_v44  ;;  %953 = vmatprep.subr.mxu1 %v363_v45  ;;  %v489_v44 = vld [vmem:[#allocation2 + $0xdc8] sm:$0xff]  ;;  %v491_v45 = vld [vmem:[#allocation2 + $0xdd8] sm:$0xff] }
 0x13d   :  { %883 = vmatpush1.xpose.msra.mxu0 %v360_v47  ;;  %954 = vmatpush1.xpose.msra.mxu1 %v362_v48  ;;  %v488_v47 = vld [vmem:[#allocation2 + $0xdc0] sm:$0xff]  ;;  %v490_v48 = vld [vmem:[#allocation2 + $0xdd0] sm:$0xff] }
 0x13e   :  { %884 = vmatprep.subr.mxu0 %v353_v50  ;;  %955 = vmatprep.subr.mxu1 %v355_v51  ;;  %v481_v50 = vld [vmem:[#allocation2 + $0xd88] sm:$0xff]  ;;  %v483_v51 = vld [vmem:[#allocation2 + $0xd98] sm:$0xff] }
 0x141   :  { %885 = vmatpush1.xpose.msra.mxu0 %v352_v52  ;;  %956 = vmatpush1.xpose.msra.mxu1 %v354_v53  ;;  %v480_v52 = vld [vmem:[#allocation2 + $0xd80] sm:$0xff]  ;;  %v482_v53 = vld [vmem:[#allocation2 + $0xd90] sm:$0xff] }
 0x142   :  { %886 = vmatprep.subr.mxu0 %v345_v54  ;;  %957 = vmatprep.subr.mxu1 %v347_v55  ;;  %v473_v54 = vld [vmem:[#allocation2 + $0xd48] sm:$0xff]  ;;  %v475_v55 = vld [vmem:[#allocation2 + $0xd58] sm:$0xff] }
 0x145   :  { %887 = vmatpush1.xpose.msra.mxu0 %v344_v56  ;;  %958 = vmatpush1.xpose.msra.mxu1 %v346_v57  ;;  %v472_v56 = vld [vmem:[#allocation2 + $0xd40] sm:$0xff]  ;;  %v474_v57 = vld [vmem:[#allocation2 + $0xd50] sm:$0xff] }
 0x146   :  { %888 = vmatprep.subr.mxu0 %v337_v58  ;;  %959 = vmatprep.subr.mxu1 %v339_v59  ;;  %v465_v58 = vld [vmem:[#allocation2 + $0xd08] sm:$0xff]  ;;  %v467_v59 = vld [vmem:[#allocation2 + $0xd18] sm:$0xff] }
 0x149   :  { %889 = vmatpush1.xpose.msra.mxu0 %v336_v60  ;;  %960 = vmatpush1.xpose.msra.mxu1 %v338_v61  ;;  %v464_v60 = vld [vmem:[#allocation2 + $0xd00] sm:$0xff]  ;;  %v466_v61 = vld [vmem:[#allocation2 + $0xd10] sm:$0xff] }
 0x14a   :  { %890 = vmatprep.subr.mxu0 %v329_v62  ;;  %961 = vmatprep.subr.mxu1 %v331_v63  ;;  %v457_v62 = vld [vmem:[#allocation2 + $0xcc8] sm:$0xff]  ;;  %v459_v63 = vld [vmem:[#allocation2 + $0xcd8] sm:$0xff] }
 0x14d   :  { %891 = vmatpush1.xpose.msra.mxu0 %v328_v0  ;;  %962 = vmatpush1.xpose.msra.mxu1 %v330_v1  ;;  %v456_v0 = vld [vmem:[#allocation2 + $0xcc0] sm:$0xff]  ;;  %v458_v1 = vld [vmem:[#allocation2 + $0xcd0] sm:$0xff] }
 0x14e   :  { %892 = vmatprep.subr.mxu0 %v321_v2  ;;  %963 = vmatprep.subr.mxu1 %v323_v3  ;;  %v449_v2 = vld [vmem:[#allocation2 + $0xc88] sm:$0xff]  ;;  %v451_v3 = vld [vmem:[#allocation2 + $0xc98] sm:$0xff] }
 0x151   :  { %893 = vmatpush1.xpose.msra.mxu0 %v320_v4  ;;  %964 = vmatpush1.xpose.msra.mxu1 %v322_v5  ;;  %v448_v4 = vld [vmem:[#allocation2 + $0xc80] sm:$0xff]  ;;  %v450_v5 = vld [vmem:[#allocation2 + $0xc90] sm:$0xff] }
 0x152   :  { %894 = vmatprep.subr.mxu0 %v313_v6  ;;  %965 = vmatprep.subr.mxu1 %v315_v7  ;;  %v441_v6 = vld [vmem:[#allocation2 + $0xc48] sm:$0xff]  ;;  %v443_v7 = vld [vmem:[#allocation2 + $0xc58] sm:$0xff] }
 0x155   :  { %895 = vmatpush1.xpose.msra.mxu0 %v312_v8  ;;  %966 = vmatpush1.xpose.msra.mxu1 %v314_v9  ;;  %v440_v8 = vld [vmem:[#allocation2 + $0xc40] sm:$0xff]  ;;  %v442_v9 = vld [vmem:[#allocation2 + $0xc50] sm:$0xff] }
 0x156   :  { %896 = vmatprep.subr.mxu0 %v305_v10  ;;  %967 = vmatprep.subr.mxu1 %v307_v11  ;;  %v433_v10 = vld [vmem:[#allocation2 + $0xc08] sm:$0xff]  ;;  %v435_v11 = vld [vmem:[#allocation2 + $0xc18] sm:$0xff] }
 0x159   :  { %897 = vmatpush1.xpose.msra.mxu0 %v304_v12  ;;  %968 = vmatpush1.xpose.msra.mxu1 %v306_v13  ;;  %v432_v12 = vld [vmem:[#allocation2 + $0xc00] sm:$0xff]  ;;  %v434_v13 = vld [vmem:[#allocation2 + $0xc10] sm:$0xff] }
 0x15a   :  { %898 = vmatprep.subr.mxu0 %v553_v14  ;;  %969 = vmatprep.subr.mxu1 %v555_v15  ;;  %v429_v14 = vld [vmem:[#allocation2 + $0xbe8] sm:$0xff]  ;;  %v431_v15 = vld [vmem:[#allocation2 + $0xbf8] sm:$0xff] }
 0x15d   :  { %899 = vmatpush2.xpose.msra.mxu0 %v552_v16  ;;  %970 = vmatpush2.xpose.msra.mxu1 %v554_v17  ;;  %v428_v16 = vld [vmem:[#allocation2 + $0xbe0] sm:$0xff]  ;;  %v430_v17 = vld [vmem:[#allocation2 + $0xbf0] sm:$0xff] }
 0x15e   :  { %900 = vmatprep.subr.mxu0 %v545_v18  ;;  %971 = vmatprep.subr.mxu1 %v547_v19  ;;  %v421_v18 = vld [vmem:[#allocation2 + $0xba8] sm:$0xff]  ;;  %v423_v19 = vld [vmem:[#allocation2 + $0xbb8] sm:$0xff] }
 0x161   :  { %901 = vmatpush2.xpose.msra.mxu0 %v544_v20  ;;  %972 = vmatpush2.xpose.msra.mxu1 %v546_v21  ;;  %v1164_v20 = vld [vmem:[%s1318_s0] sm:$0xff]  ;;  %v1165_v21 = vld [vmem:[%s1318_s0 + $0x10] sm:$0xff] }
 0x162   :  { %902 = vmatprep.subr.mxu0 %v537_v22  ;;  %973 = vmatprep.subr.mxu1 %v539_v23  ;;  %v420_v22 = vld [vmem:[#allocation2 + $0xba0] sm:$0xff]  ;;  %v422_v23 = vld [vmem:[#allocation2 + $0xbb0] sm:$0xff] }
 0x165   :  { %903 = vmatpush2.xpose.msra.mxu0 %v536_v24  ;;  %974 = vmatpush2.xpose.msra.mxu1 %v538_v25  ;;  %v413_v24 = vld [vmem:[#allocation2 + $0xb68] sm:$0xff]  ;;  %v415_v25 = vld [vmem:[#allocation2 + $0xb78] sm:$0xff] }
 0x166   :  { %904 = vmatprep.subr.mxu0 %v529_v26  ;;  %975 = vmatprep.subr.mxu1 %v531_v27  ;;  %v1166_v26 = vld [vmem:[%s1318_s0 + $0x28] sm:$0xff]  ;;  %v1167_v27 = vld [vmem:[%s1318_s0 + $0x38] sm:$0xff] }
 0x169   :  { %905 = vmatpush2.xpose.msra.mxu0 %v528_v28  ;;  %976 = vmatpush2.xpose.msra.mxu1 %v530_v29  ;;  %v412_v28 = vld [vmem:[#allocation2 + $0xb60] sm:$0xff]  ;;  %v414_v29 = vld [vmem:[#allocation2 + $0xb70] sm:$0xff] }
 0x16a   :  { %906 = vmatprep.subr.mxu0 %v521_v30  ;;  %977 = vmatprep.subr.mxu1 %v523_v31  ;;  %v405_v30 = vld [vmem:[#allocation2 + $0xb28] sm:$0xff]  ;;  %v407_v31 = vld [vmem:[#allocation2 + $0xb38] sm:$0xff] }
 0x16d   :  { %907 = vmatpush2.xpose.msra.mxu0 %v520_v46  ;;  %978 = vmatpush2.xpose.msra.mxu1 %v522_v49  ;;  %v404_v46 = vld [vmem:[#allocation2 + $0xb20] sm:$0xff]  ;;  %v406_v49 = vld [vmem:[#allocation2 + $0xb30] sm:$0xff] }
 0x16e   :  { %908 = vmatprep.subr.mxu0 %v513_v32  ;;  %979 = vmatprep.subr.mxu1 %v515_v33  ;;  %v397_v32 = vld [vmem:[#allocation2 + $0xae8] sm:$0xff]  ;;  %v399_v33 = vld [vmem:[#allocation2 + $0xaf8] sm:$0xff] }
 0x171   :  { %909 = vmatpush2.xpose.msra.mxu0 %v512_v34  ;;  %980 = vmatpush2.xpose.msra.mxu1 %v514_v35  ;;  %v396_v34 = vld [vmem:[#allocation2 + $0xae0] sm:$0xff]  ;;  %v398_v35 = vld [vmem:[#allocation2 + $0xaf0] sm:$0xff] }
 0x172   :  { %910 = vmatprep.subr.mxu0 %v505_v36  ;;  %981 = vmatprep.subr.mxu1 %v507_v37  ;;  %v389_v36 = vld [vmem:[#allocation2 + $0xaa8] sm:$0xff]  ;;  %v391_v37 = vld [vmem:[#allocation2 + $0xab8] sm:$0xff] }
 0x175   :  { %911 = vmatpush2.xpose.msra.mxu0 %v504_v38  ;;  %982 = vmatpush2.xpose.msra.mxu1 %v506_v39  ;;  %v388_v38 = vld [vmem:[#allocation2 + $0xaa0] sm:$0xff]  ;;  %v390_v39 = vld [vmem:[#allocation2 + $0xab0] sm:$0xff] }
 0x176   :  { %912 = vmatprep.subr.mxu0 %v497_v40  ;;  %983 = vmatprep.subr.mxu1 %v499_v41  ;;  %v381_v40 = vld [vmem:[#allocation2 + $0xa68] sm:$0xff]  ;;  %v383_v41 = vld [vmem:[#allocation2 + $0xa78] sm:$0xff] }
 0x179   :  { %913 = vmatpush2.xpose.msra.mxu0 %v496_v42  ;;  %984 = vmatpush2.xpose.msra.mxu1 %v498_v43  ;;  %v380_v42 = vld [vmem:[#allocation2 + $0xa60] sm:$0xff]  ;;  %v382_v43 = vld [vmem:[#allocation2 + $0xa70] sm:$0xff] }
 0x17a   :  { %914 = vmatprep.subr.mxu0 %v489_v44  ;;  %985 = vmatprep.subr.mxu1 %v491_v45  ;;  %v373_v44 = vld [vmem:[#allocation2 + $0xa28] sm:$0xff]  ;;  %v375_v45 = vld [vmem:[#allocation2 + $0xa38] sm:$0xff] }
 0x17d   :  { %915 = vmatpush2.xpose.msra.mxu0 %v488_v47  ;;  %986 = vmatpush2.xpose.msra.mxu1 %v490_v48  ;;  %v372_v47 = vld [vmem:[#allocation2 + $0xa20] sm:$0xff]  ;;  %v374_v48 = vld [vmem:[#allocation2 + $0xa30] sm:$0xff] }
 0x17e   :  { %916 = vmatprep.subr.mxu0 %v481_v50  ;;  %987 = vmatprep.subr.mxu1 %v483_v51  ;;  %v365_v50 = vld [vmem:[#allocation2 + $0x9e8] sm:$0xff]  ;;  %v367_v51 = vld [vmem:[#allocation2 + $0x9f8] sm:$0xff] }
 0x181   :  { %917 = vmatpush2.xpose.msra.mxu0 %v480_v52  ;;  %988 = vmatpush2.xpose.msra.mxu1 %v482_v53  ;;  %v364_v52 = vld [vmem:[#allocation2 + $0x9e0] sm:$0xff]  ;;  %v366_v53 = vld [vmem:[#allocation2 + $0x9f0] sm:$0xff] }
 0x182   :  { %918 = vmatprep.subr.mxu0 %v473_v54  ;;  %989 = vmatprep.subr.mxu1 %v475_v55  ;;  %v357_v54 = vld [vmem:[#allocation2 + $0x9a8] sm:$0xff]  ;;  %v359_v55 = vld [vmem:[#allocation2 + $0x9b8] sm:$0xff] }
 0x185   :  { %919 = vmatpush2.xpose.msra.mxu0 %v472_v56  ;;  %990 = vmatpush2.xpose.msra.mxu1 %v474_v57  ;;  %v356_v56 = vld [vmem:[#allocation2 + $0x9a0] sm:$0xff]  ;;  %v358_v57 = vld [vmem:[#allocation2 + $0x9b0] sm:$0xff] }
 0x186   :  { %920 = vmatprep.subr.mxu0 %v465_v58  ;;  %991 = vmatprep.subr.mxu1 %v467_v59  ;;  %v349_v58 = vld [vmem:[#allocation2 + $0x968] sm:$0xff]  ;;  %v351_v59 = vld [vmem:[#allocation2 + $0x978] sm:$0xff] }
 0x189   :  { %921 = vmatpush2.xpose.msra.mxu0 %v464_v60  ;;  %992 = vmatpush2.xpose.msra.mxu1 %v466_v61  ;;  %v348_v60 = vld [vmem:[#allocation2 + $0x960] sm:$0xff]  ;;  %v350_v61 = vld [vmem:[#allocation2 + $0x970] sm:$0xff] }
 0x18a   :  { %922 = vmatprep.subr.mxu0 %v457_v62  ;;  %993 = vmatprep.subr.mxu1 %v459_v63  ;;  %v341_v62 = vld [vmem:[#allocation2 + $0x928] sm:$0xff]  ;;  %v343_v63 = vld [vmem:[#allocation2 + $0x938] sm:$0xff] }
 0x18d   :  { %923 = vmatpush2.xpose.msra.mxu0 %v456_v0  ;;  %994 = vmatpush2.xpose.msra.mxu1 %v458_v1  ;;  %v340_v0 = vld [vmem:[#allocation2 + $0x920] sm:$0xff]  ;;  %v342_v1 = vld [vmem:[#allocation2 + $0x930] sm:$0xff] }
 0x18e   :  { %924 = vmatprep.subr.mxu0 %v449_v2  ;;  %995 = vmatprep.subr.mxu1 %v451_v3  ;;  %v562_v2 = vlaneseq  ;;  %v333_v3 = vld [vmem:[#allocation2 + $0x8e8] sm:$0xff] }
 0x191   :  { %925 = vmatpush2.xpose.msra.mxu0 %v448_v4  ;;  %996 = vmatpush2.xpose.msra.mxu1 %v450_v5  ;;  %v335_v4 = vld [vmem:[#allocation2 + $0x8f8] sm:$0xff]  ;;  %v332_v5 = vld [vmem:[#allocation2 + $0x8e0] sm:$0xff] }
 0x192   :  { %926 = vmatprep.subr.mxu0 %v441_v6  ;;  %997 = vmatprep.subr.mxu1 %v443_v7  ;;  %v334_v6 = vld [vmem:[#allocation2 + $0x8f0] sm:$0xff]  ;;  %v1288_v7 = vshrl.u32 %v562_v2, 7  ;;  %v511_v2 = vld [vmem:[#allocation2 + $0xe78] sm:$0xff] }
 0x195   :  { %927 = vmatpush2.xpose.msra.mxu0 %v440_v8  ;;  %998 = vmatpush2.xpose.msra.mxu1 %v442_v9  ;;  %v325_v8 = vld [vmem:[#allocation2 + $0x8a8] sm:$0xff]  ;;  %v327_v9 = vld [vmem:[#allocation2 + $0x8b8] sm:$0xff] }
 0x196   :  { %928 = vmatprep.subr.mxu0 %v433_v10  ;;  %999 = vmatprep.subr.mxu1 %v435_v11  ;;  %v324_v10 = vld [vmem:[#allocation2 + $0x8a0] sm:$0xff]  ;;  %v326_v11 = vld [vmem:[#allocation2 + $0x8b0] sm:$0xff] }
 0x199   :  { %929 = vmatpush2.xpose.msra.mxu0 %v432_v12  ;;  %1000 = vmatpush2.xpose.msra.mxu1 %v434_v13  ;;  %v564_v12 = vsub.s32 0, %v1288_v7  ;;  %v317_v13 = vld [vmem:[#allocation2 + $0x868] sm:$0xff] }
 0x19a   :  { %1008 = vmatprep.subr.mxu0 %v429_v14  ;;  %1079 = vmatprep.subr.mxu1 %v431_v15  ;;  %v319_v14 = vld [vmem:[#allocation2 + $0x878] sm:$0xff]  ;;  %v1291_v15 = vld [vmem:[#allocation4] sm:$0xf] }
 0x19c   :  { %931 = vmatmul.mubr.f32.vlgmr.msra.gmra.mxu0 %v1164_v20  ;;  %1002 = vmatmul.mubr.f32.vlgmr.msra.gmra.mxu1 %v1165_v21  ;;  %v565_v20 = vrot.slane %v1291_v15, %v564_v12  ;;  %v309_v21 = vld [vmem:[#allocation2 + $0x828] sm:$0xff]  ;;  %v492_v12 = vld [vmem:[#allocation2 + $0xde0] sm:$0xff] }
 0x19d   :  { %1009 = vmatpush1.xpose.msra.mxu0 %v428_v16  ;;  %1080 = vmatpush1.xpose.msra.mxu1 %v430_v17  ;;  %v568_v16 = vsub.s32 1, %v1288_v7  ;;  %v648_v17 = vpop.f32.mrf.mxu0 }
 0x19e   :  { %1010 = vmatprep.subr.mxu0 %v421_v18  ;;  %1081 = vmatprep.subr.mxu1 %v423_v19  ;;  %v316_v18 = vld [vmem:[#allocation2 + $0x860] sm:$0xff]  ;;  %v318_v19 = vld [vmem:[#allocation2 + $0x870] sm:$0xff] }
 0x19f   :  { %1072 = vmatprep.mubr.f32.mxu0 %v1166_v26  ;;  %1143 = vmatprep.mubr.f32.mxu1 %v1167_v27  ;;  %v308_v26 = vld [vmem:[#allocation2 + $0x820] sm:$0xff]  ;;  %v310_v27 = vld [vmem:[#allocation2 + $0x830] sm:$0xff] }
 0x1a1   :  { %1011 = vmatpush1.xpose.msra.mxu0 %v420_v22  ;;  %1082 = vmatpush1.xpose.msra.mxu1 %v422_v23  ;;  %v311_v22 = vld [vmem:[#allocation2 + $0x838] sm:$0xff]  ;;  %v569_v23 = vrot.slane %v1291_v15, %v568_v16 }
 0x1a2   :  { %1012 = vmatprep.subr.mxu0 %v413_v24  ;;  %1083 = vmatprep.subr.mxu1 %v415_v25  ;;  %v719_v24 = vpop.f32.mrf.mxu1  ;;  %v650_v25 = vpop.f32.mrf.mxu0  ;;  %v487_v16 = vld [vmem:[#allocation2 + $0xdb8] sm:$0xff] }
 0x1a5   :  { %1013 = vmatpush1.xpose.msra.mxu0 %v412_v28  ;;  %1084 = vmatpush1.xpose.msra.mxu1 %v414_v29  ;;  %v649_v28 = vadd.f32 %v648_v17, %v565_v20  ;;  %v557_v29 = vld [vmem:[#allocation2 + $0xfe8] sm:$0xff]  ;;  %v484_v17 = vld [vmem:[#allocation2 + $0xda0] sm:$0xff]  ;;  %v479_v20 = vld [vmem:[#allocation2 + $0xd78] sm:$0xff] }
 0x1a6   :  { %1014 = vmatprep.subr.mxu0 %v405_v30  ;;  %1085 = vmatprep.subr.mxu1 %v407_v31  ;;  %v559_v30 = vld [vmem:[#allocation2 + $0xff8] sm:$0xff]  ;;  %v651_v31 = vadd.f32 %v650_v25, %v569_v23  ;;  %v469_v23 = vld [vmem:[#allocation2 + $0xd28] sm:$0xff]  ;;  %v468_v25 = vld [vmem:[#allocation2 + $0xd20] sm:$0xff] }
 0x1a9   :  { %1015 = vmatpush1.xpose.msra.mxu0 %v404_v46  ;;  %1086 = vmatpush1.xpose.msra.mxu1 %v406_v49  ;;  %v721_v46 = vpop.f32.mrf.mxu1  ;;  %v556_v49 = vld [vmem:[#allocation2 + $0xfe0] sm:$0xff] }
 0x1aa   :  { %1016 = vmatprep.subr.mxu0 %v397_v32  ;;  %1087 = vmatprep.subr.mxu1 %v399_v33  ;;  %v558_v32 = vld [vmem:[#allocation2 + $0xff0] sm:$0xff]  ;;  %v720_v33 = vadd.f32 %v719_v24, %v649_v28  ;;  %v471_v24 = vld [vmem:[#allocation2 + $0xd38] sm:$0xff] }
 0x1ab   :  { %v463_v28 = vld [vmem:[#allocation2 + $0xcf8] sm:$0xff] }
 0x1ad   :  { %1017 = vmatpush1.xpose.msra.mxu0 %v396_v34  ;;  %1088 = vmatpush1.xpose.msra.mxu1 %v398_v35  ;;  %v549_v34 = vld [vmem:[#allocation2 + $0xfa8] sm:$0xff]  ;;  %v551_v35 = vld [vmem:[#allocation2 + $0xfb8] sm:$0xff] }
 0x1ae   :  { %1018 = vmatprep.subr.mxu0 %v389_v36  ;;  %1089 = vmatprep.subr.mxu1 %v391_v37 }
 0x1b1   :  { %1019 = vmatpush1.xpose.msra.mxu0 %v388_v38  ;;  %1090 = vmatpush1.xpose.msra.mxu1 %v390_v39  ;;  %v722_v38 = vadd.f32 %v721_v46, %v651_v31  ;;  %v453_v31 = vld [vmem:[#allocation2 + $0xca8] sm:$0xff]  ;;  %v455_v46 = vld [vmem:[#allocation2 + $0xcb8] sm:$0xff] }
 0x1b2   :  { %1020 = vmatprep.subr.mxu0 %v381_v40  ;;  %1091 = vmatprep.subr.mxu1 %v383_v41 }
 0x1b5   :  { %1021 = vmatpush1.xpose.msra.mxu0 %v380_v42  ;;  %1092 = vmatpush1.xpose.msra.mxu1 %v382_v43  ;;  %v548_v42 = vld [vmem:[#allocation2 + $0xfa0] sm:$0xff]  ;;  %v550_v43 = vld [vmem:[#allocation2 + $0xfb0] sm:$0xff] }
 0x1b6   :  { %1022 = vmatprep.subr.mxu0 %v373_v44  ;;  %1093 = vmatprep.subr.mxu1 %v375_v45 }
 0x1b9   :  { %1023 = vmatpush1.xpose.msra.mxu0 %v372_v47  ;;  %1094 = vmatpush1.xpose.msra.mxu1 %v374_v48  ;;  %v541_v47 = vld [vmem:[#allocation2 + $0xf68] sm:$0xff]  ;;  %v543_v48 = vld [vmem:[#allocation2 + $0xf78] sm:$0xff] }
 0x1ba   :  { %1024 = vmatprep.subr.mxu0 %v365_v50  ;;  %1095 = vmatprep.subr.mxu1 %v367_v51  ;;  %v540_v51 = vld [vmem:[#allocation2 + $0xf60] sm:$0xff] }
 0x1bd   :  { %1025 = vmatpush1.xpose.msra.mxu0 %v364_v52  ;;  %1096 = vmatpush1.xpose.msra.mxu1 %v366_v53  ;;  %v542_v52 = vld [vmem:[#allocation2 + $0xf70] sm:$0xff]  ;;  %v533_v53 = vld [vmem:[#allocation2 + $0xf28] sm:$0xff] }
 0x1be   :  { %1026 = vmatprep.subr.mxu0 %v357_v54  ;;  %1097 = vmatprep.subr.mxu1 %v359_v55  ;;  %v535_v54 = vld [vmem:[#allocation2 + $0xf38] sm:$0xff]  ;;  %v532_v55 = vld [vmem:[#allocation2 + $0xf20] sm:$0xff] }
 0x1c1   :  { %1027 = vmatpush1.xpose.msra.mxu0 %v356_v56  ;;  %1098 = vmatpush1.xpose.msra.mxu1 %v358_v57  ;;  %v534_v56 = vld [vmem:[#allocation2 + $0xf30] sm:$0xff]  ;;  %v525_v57 = vld [vmem:[#allocation2 + $0xee8] sm:$0xff] }
 0x1c2   :  { %1028 = vmatprep.subr.mxu0 %v349_v58  ;;  %1099 = vmatprep.subr.mxu1 %v351_v59  ;;  %v527_v58 = vld [vmem:[#allocation2 + $0xef8] sm:$0xff]  ;;  %v524_v59 = vld [vmem:[#allocation2 + $0xee0] sm:$0xff] }
 0x1c5   :  { %1029 = vmatpush1.xpose.msra.mxu0 %v348_v60  ;;  %1100 = vmatpush1.xpose.msra.mxu1 %v350_v61  ;;  %v526_v60 = vld [vmem:[#allocation2 + $0xef0] sm:$0xff]  ;;  %v517_v61 = vld [vmem:[#allocation2 + $0xea8] sm:$0xff] }
 0x1c6   :  { %1030 = vmatprep.subr.mxu0 %v341_v62  ;;  %1101 = vmatprep.subr.mxu1 %v343_v63  ;;  %v519_v62 = vld [vmem:[#allocation2 + $0xeb8] sm:$0xff]  ;;  %v516_v63 = vld [vmem:[#allocation2 + $0xea0] sm:$0xff] }
 0x1c9   :  { %1031 = vmatpush1.xpose.msra.mxu0 %v340_v0  ;;  %1102 = vmatpush1.xpose.msra.mxu1 %v342_v1  ;;  %v518_v0 = vld [vmem:[#allocation2 + $0xeb0] sm:$0xff]  ;;  %v509_v1 = vld [vmem:[#allocation2 + $0xe68] sm:$0xff] }
 0x1ca   :  { %1032 = vmatprep.subr.mxu0 %v333_v3  ;;  %1103 = vmatprep.subr.mxu1 %v335_v4  ;;  %v508_v3 = vld [vmem:[#allocation2 + $0xe60] sm:$0xff]  ;;  %v510_v4 = vld [vmem:[#allocation2 + $0xe70] sm:$0xff] }
 0x1cd   :  { %1033 = vmatpush1.xpose.msra.mxu0 %v332_v5  ;;  %1104 = vmatpush1.xpose.msra.mxu1 %v334_v6  ;;  %v501_v5 = vld [vmem:[#allocation2 + $0xe28] sm:$0xff]  ;;  %v503_v6 = vld [vmem:[#allocation2 + $0xe38] sm:$0xff] }
 0x1ce   :  { %1034 = vmatprep.subr.mxu0 %v325_v8  ;;  %1105 = vmatprep.subr.mxu1 %v327_v9  ;;  %v500_v8 = vld [vmem:[#allocation2 + $0xe20] sm:$0xff]  ;;  %v502_v9 = vld [vmem:[#allocation2 + $0xe30] sm:$0xff] }
 0x1d1   :  { %1035 = vmatpush1.xpose.msra.mxu0 %v324_v10  ;;  %1106 = vmatpush1.xpose.msra.mxu1 %v326_v11  ;;  %v493_v10 = vld [vmem:[#allocation2 + $0xde8] sm:$0xff]  ;;  %v495_v11 = vld [vmem:[#allocation2 + $0xdf8] sm:$0xff] }
 0x1d2   :  { %1036 = vmatprep.subr.mxu0 %v317_v13  ;;  %1107 = vmatprep.subr.mxu1 %v319_v14  ;;  %v494_v13 = vld [vmem:[#allocation2 + $0xdf0] sm:$0xff]  ;;  %v485_v14 = vld [vmem:[#allocation2 + $0xda8] sm:$0xff] }
 0x1d5   :  { %1037 = vmatpush1.xpose.msra.mxu0 %v316_v18  ;;  %1108 = vmatpush1.xpose.msra.mxu1 %v318_v19  ;;  %v486_v18 = vld [vmem:[#allocation2 + $0xdb0] sm:$0xff]  ;;  %v477_v19 = vld [vmem:[#allocation2 + $0xd68] sm:$0xff] }
 0x1d6   :  { %1038 = vmatprep.subr.mxu0 %v309_v21  ;;  %1109 = vmatprep.subr.mxu1 %v311_v22  ;;  %v476_v21 = vld [vmem:[#allocation2 + $0xd60] sm:$0xff]  ;;  %v478_v22 = vld [vmem:[#allocation2 + $0xd70] sm:$0xff] }
 0x1d9   :  { %1039 = vmatpush1.xpose.msra.mxu0 %v308_v26  ;;  %1110 = vmatpush1.xpose.msra.mxu1 %v310_v27  ;;  %v470_v26 = vld [vmem:[#allocation2 + $0xd30] sm:$0xff]  ;;  %v461_v27 = vld [vmem:[#allocation2 + $0xce8] sm:$0xff] }
 0x1da   :  { %1040 = vmatprep.subr.mxu0 %v557_v29  ;;  %1111 = vmatprep.subr.mxu1 %v559_v30  ;;  %v460_v29 = vld [vmem:[#allocation2 + $0xce0] sm:$0xff]  ;;  %v462_v30 = vld [vmem:[#allocation2 + $0xcf0] sm:$0xff] }
 0x1dc   :  { %v790_v36 = vpop.f32.mrf.mxu0  ;;  %v861_v37 = vpop.f32.mrf.mxu1 }
 0x1dd   :  { %v791_v39 = vadd.f32 %v790_v36, %v720_v33  ;;  %1041 = vmatpush2.xpose.msra.mxu0 %v556_v49  ;;  %1112 = vmatpush2.xpose.msra.mxu1 %v558_v32  ;;  %v452_v49 = vld [vmem:[#allocation2 + $0xca0] sm:$0xff]  ;;  %v454_v32 = vld [vmem:[#allocation2 + $0xcb0] sm:$0xff]  ;;  %v445_v33 = vld [vmem:[#allocation2 + $0xc68] sm:$0xff] }
 0x1de   :  { %v792_v40 = vpop.f32.mrf.mxu0  ;;  %v863_v41 = vpop.f32.mrf.mxu1  ;;  %1042 = vmatprep.subr.mxu0 %v549_v34  ;;  %1113 = vmatprep.subr.mxu1 %v551_v35  ;;  %v447_v34 = vld [vmem:[#allocation2 + $0xc78] sm:$0xff]  ;;  %v444_v35 = vld [vmem:[#allocation2 + $0xc60] sm:$0xff]  ;;  %v446_v36 = vld [vmem:[#allocation2 + $0xc70] sm:$0xff] }
 0x1df   :  { %v862_v44 = vadd.f32 %v861_v37, %v791_v39  ;;  %v793_v45 = vadd.f32 %v792_v40, %v722_v38  ;;  %v437_v37 = vld [vmem:[#allocation2 + $0xc28] sm:$0xff]  ;;  %v439_v38 = vld [vmem:[#allocation2 + $0xc38] sm:$0xff]  ;;  %v436_v39 = vld [vmem:[#allocation2 + $0xc20] sm:$0xff] }
 0x1e0   :  { %v438_v40 = vld [vmem:[#allocation2 + $0xc30] sm:$0xff] }
 0x1e1   :  { %1150 = vst [vmem:[%s1321_s3] sm:$0xff] %v862_v44  ;;  %v864_v50 = vadd.f32 %v863_v41, %v793_v45  ;;  %1043 = vmatpush2.xpose.msra.mxu0 %v548_v42  ;;  %1114 = vmatpush2.xpose.msra.mxu1 %v550_v43  ;;  %v1168_v41 = vld [vmem:[%s1318_s0 + $0x20] sm:$0xff]  ;;  %v1169_v42 = vld [vmem:[%s1318_s0 + $0x30] sm:$0xff]  ;;  %v572_v43 = vsub.s32 2, %v1288_v7  ;;  %v576_v44 = vsub.s32 3, %v1288_v7 }
 0x1e2   :  { %1044 = vmatprep.subr.mxu0 %v541_v47  ;;  %1115 = vmatprep.subr.mxu1 %v543_v48 }
 0x1e3   :  { %1151 = vst [vmem:[%s1321_s3 + $0x8] sm:$0xff] %v864_v50  ;;  %v573_v47 = vrot.slane %v1291_v15, %v572_v43  ;;  %v577_v48 = vrot.slane %v1291_v15, %v576_v44 }
 0x1e5   :  { %1045 = vmatpush2.xpose.msra.mxu0 %v540_v51  ;;  %1116 = vmatpush2.xpose.msra.mxu1 %v542_v52 }
 0x1e6   :  { %1046 = vmatprep.subr.mxu0 %v533_v53  ;;  %1117 = vmatprep.subr.mxu1 %v535_v54 }
 0x1e9   :  { %1047 = vmatpush2.xpose.msra.mxu0 %v532_v55  ;;  %1118 = vmatpush2.xpose.msra.mxu1 %v534_v56 }
 0x1ea   :  { %1048 = vmatprep.subr.mxu0 %v525_v57  ;;  %1119 = vmatprep.subr.mxu1 %v527_v58 }
 0x1ed   :  { %1049 = vmatpush2.xpose.msra.mxu0 %v524_v59  ;;  %1120 = vmatpush2.xpose.msra.mxu1 %v526_v60 }
 0x1ee   :  { %1050 = vmatprep.subr.mxu0 %v517_v61  ;;  %1121 = vmatprep.subr.mxu1 %v519_v62 }
 0x1f1   :  { %1051 = vmatpush2.xpose.msra.mxu0 %v516_v63  ;;  %1122 = vmatpush2.xpose.msra.mxu1 %v518_v0 }
 0x1f2   :  { %1052 = vmatprep.subr.mxu0 %v509_v1  ;;  %1123 = vmatprep.subr.mxu1 %v511_v2 }
 0x1f5   :  { %1053 = vmatpush2.xpose.msra.mxu0 %v508_v3  ;;  %1124 = vmatpush2.xpose.msra.mxu1 %v510_v4 }
 0x1f6   :  { %1054 = vmatprep.subr.mxu0 %v501_v5  ;;  %1125 = vmatprep.subr.mxu1 %v503_v6 }
 0x1f9   :  { %1055 = vmatpush2.xpose.msra.mxu0 %v500_v8  ;;  %1126 = vmatpush2.xpose.msra.mxu1 %v502_v9 }
 0x1fa   :  { %1056 = vmatprep.subr.mxu0 %v493_v10  ;;  %1127 = vmatprep.subr.mxu1 %v495_v11 }
 0x1fd   :  { %1057 = vmatpush2.xpose.msra.mxu0 %v492_v12  ;;  %1128 = vmatpush2.xpose.msra.mxu1 %v494_v13 }
 0x1fe   :  { %1058 = vmatprep.subr.mxu0 %v485_v14  ;;  %1129 = vmatprep.subr.mxu1 %v487_v16 }
 0x201   :  { %1059 = vmatpush2.xpose.msra.mxu0 %v484_v17  ;;  %1130 = vmatpush2.xpose.msra.mxu1 %v486_v18 }
 0x202   :  { %1060 = vmatprep.subr.mxu0 %v477_v19  ;;  %1131 = vmatprep.subr.mxu1 %v479_v20 }
 0x205   :  { %1061 = vmatpush2.xpose.msra.mxu0 %v476_v21  ;;  %1132 = vmatpush2.xpose.msra.mxu1 %v478_v22 }
 0x206   :  { %1062 = vmatprep.subr.mxu0 %v469_v23  ;;  %1133 = vmatprep.subr.mxu1 %v471_v24 }
 0x209   :  { %1063 = vmatpush2.xpose.msra.mxu0 %v468_v25  ;;  %1134 = vmatpush2.xpose.msra.mxu1 %v470_v26 }
 0x20a   :  { %1064 = vmatprep.subr.mxu0 %v461_v27  ;;  %1135 = vmatprep.subr.mxu1 %v463_v28 }
 0x20d   :  { %1065 = vmatpush2.xpose.msra.mxu0 %v460_v29  ;;  %1136 = vmatpush2.xpose.msra.mxu1 %v462_v30 }
 0x20e   :  { %1066 = vmatprep.subr.mxu0 %v453_v31  ;;  %1137 = vmatprep.subr.mxu1 %v455_v46 }
 0x211   :  { %1067 = vmatpush2.xpose.msra.mxu0 %v452_v49  ;;  %1138 = vmatpush2.xpose.msra.mxu1 %v454_v32 }
 0x212   :  { %1068 = vmatprep.subr.mxu0 %v445_v33  ;;  %1139 = vmatprep.subr.mxu1 %v447_v34 }
 0x215   :  { %1069 = vmatpush2.xpose.msra.mxu0 %v444_v35  ;;  %1140 = vmatpush2.xpose.msra.mxu1 %v446_v36 }
 0x216   :  { %1070 = vmatprep.subr.mxu0 %v437_v37  ;;  %1141 = vmatprep.subr.mxu1 %v439_v38 }
 0x219   :  { %1071 = vmatpush2.xpose.msra.mxu0 %v436_v39  ;;  %1142 = vmatpush2.xpose.msra.mxu1 %v438_v40 }
 0x21c   :  { %1073 = vmatmul.mubr.f32.vlgmr.msra.gmra.mxu0 %v1168_v41  ;;  %1144 = vmatmul.mubr.f32.vlgmr.msra.gmra.mxu1 %v1169_v42 }
 0x25c   :  { %v932_v45 = vpop.f32.mrf.mxu0  ;;  %v1003_v50 = vpop.f32.mrf.mxu1 }
 0x25d   :  { %v933_v52 = vadd.f32 %v932_v45, %v573_v47 }
 0x25e   :  { %v934_v51 = vpop.f32.mrf.mxu0  ;;  %v1005_v54 = vpop.f32.mrf.mxu1 }
 0x25f   :  { %v935_v53 = vadd.f32 %v934_v51, %v577_v48  ;;  %v1004_v55 = vadd.f32 %v1003_v50, %v933_v52 }
 0x261   :  { %v1006_v58 = vadd.f32 %v1005_v54, %v935_v53 }
 0x2dc   :  { %v1074_v56 = vpop.f32.mrf.mxu0  ;;  %v1145_v57 = vpop.f32.mrf.mxu1 }
 0x2dd   :  { %v1075_v59 = vadd.f32 %v1074_v56, %v1004_v55 }
 0x2de   :  { %v1076_v60 = vpop.f32.mrf.mxu0  ;;  %v1147_v63 = vpop.f32.mrf.mxu1 }
 0x2df   :  { %v1146_v61 = vadd.f32 %v1145_v57, %v1075_v59  ;;  %v1077_v62 = vadd.f32 %v1076_v60, %v1006_v58 }
 0x2e1   :  { %1152 = vst [vmem:[%s1321_s3 + $0x10] sm:$0xff] %v1146_v61  ;;  %v1148_v7 = vadd.f32 %v1147_v63, %v1077_v62 }
 0x2e3   :  { %1153 = vst [vmem:[%s1321_s3 + $0x18] sm:$0xff] %v1148_v7 }
 0x2e4   :  { %1158 = vsyncpa [#allocation3], 1 }
 0x2e5   :  { %1159 = vsyncpa [#allocation5], 1 }

</bundles_post_ra>
